<compile_context>
chip_gen: v6e
topology: v6e:2x2x1
jax: 0.10.0
libtpu: 0.0.40
codegen_flags: <defaults>
</compile_context>

<pallas_src>
import functools

import jax
import jax.numpy as jnp
import numpy as np
from jax.experimental import pallas as pl
from jax.experimental.pallas import tpu as pltpu


# ----------------------------------------------------------------------------
# Bilinear (align_corners=True) interpolation matrix: out = M @ in along one axis.
# ----------------------------------------------------------------------------
def bilinear_matrix(out_size, in_size):
    m = np.zeros((out_size, in_size), dtype=np.float64)
    if in_size == 1 or out_size == 1:
        m[:, 0] = 1.0
        return m.astype(np.float32)
    o = np.arange(out_size, dtype=np.float64)
    src = o * (in_size - 1) / (out_size - 1)            # align_corners=True mapping
    i0 = np.clip(np.floor(src).astype(np.int64), 0, in_size - 2)
    frac = src - i0
    m[np.arange(out_size), i0] += 1.0 - frac
    m[np.arange(out_size), i0 + 1] += frac
    return m.astype(np.float32)


# ----------------------------------------------------------------------------
# Fused kernel, upscale=True.  Per grid step (batch n, parallel-split p, H-tile h):
#   a_ref  : (1, C1, TH*W)   a-branch input tile (NCHW flattened spatially)
#   b_ref  : (1, C2, Hb*Wb)  full (small) b-branch input for this batch
#   wa/ba  : (C1out, C1), (C1out, 1)   BN-folded conv2 (applied to a)
#   wb/bb  : (C2out, C2), (C2out, 1)   BN-folded conv1 (applied to b)
#   uwT_ref: (Wb, W)         W-direction bilinear matrix, transposed
#   uh_ref : (H, Hb)         H-direction bilinear matrix (full, tiny)
#   o_ref  : (1, Ctot, TH*W) lane-dense output tile (channels = sublanes)
#   bw_ref : VMEM scratch (C2out, Hb, W): ReLU(conv1(b)) upsampled along W,
#            computed once per (n, p) and reused for every H-tile.
# ----------------------------------------------------------------------------
def _block_a_upscale_kernel(a_ref, b_ref, wa_ref, ba_ref, wb_ref, bb_ref,
                            uwT_ref, uh_ref, o_ref, bw_ref, *, th, h_inner):
    c1out = wa_ref.shape[0]
    c2out, hb, w_up = bw_ref.shape
    w_in = uwT_ref.shape[0]

    # ---- Stage 1 (once per (n, p)): b-branch conv+ReLU and the W-direction
    # half of the bilinear upsample, cached in the persistent VMEM scratch. ----
    @pl.when(pl.program_id(2) == 0)
    def _():
        b_conv = jnp.maximum(
            jnp.dot(wb_ref[...], b_ref[0], preferred_element_type=jnp.float32)
            + bb_ref[...], 0.0)                                     # (C2out, Hb*Wb)
        for j in range(hb):                                          # static unroll
            row = b_conv[:, j * w_in:(j + 1) * w_in]                 # (C2out, Wb)
            bw_ref[:, j, :] = jnp.dot(row, uwT_ref[...],
                                      preferred_element_type=jnp.float32)

    # ---- Stage 2 (every H-tile): a-branch conv+ReLU, and the H-direction half
    # of the bilinear upsample of the cached b, written to disjoint channels. ----
    a_out = jnp.maximum(
        jnp.dot(wa_ref[...], a_ref[0], preferred_element_type=jnp.float32)
        + ba_ref[...], 0.0)                                          # (C1out, TH*W)
    o_ref[0, :c1out, :] = a_out.astype(o_ref.dtype)

    row0 = (pl.program_id(1) * h_inner + pl.program_id(2)) * th
    if th % 8 == 0:
        row0 = pl.multiple_of(row0, 8)
    uh_tile = uh_ref[pl.ds(row0, th), :]                             # (TH, Hb)
    uh_b = jnp.broadcast_to(uh_tile[None, :, :], (c2out, th, hb))
    b_up = jnp.einsum('cth,chw->ctw', uh_b, bw_ref[...],
                      preferred_element_type=jnp.float32)            # (C2out, TH, W)
    for t in range(th):                                              # static unroll
        o_ref[0, c1out:, t * w_up:(t + 1) * w_up] = b_up[:, t, :].astype(o_ref.dtype)
    # NOTE: if out_c1 is not a multiple of 8 the b-branch stores start mid
    # sublane-group (masked RMW); MLSD configs (8/32/64) are aligned.


# ----------------------------------------------------------------------------
# Fused kernel, upscale=False: two lane-dense 1x1 convs + single full-tile store.
# ----------------------------------------------------------------------------
def _block_a_noupscale_kernel(a_ref, b_ref, wa_ref, ba_ref, wb_ref, bb_ref, o_ref):
    a_out = jnp.maximum(
        jnp.dot(wa_ref[...], a_ref[0], preferred_element_type=jnp.float32)
        + ba_ref[...], 0.0)
    b_out = jnp.maximum(
        jnp.dot(wb_ref[...], b_ref[0], preferred_element_type=jnp.float32)
        + bb_ref[...], 0.0)
    o_ref[0] = jnp.concatenate([a_out, b_out], axis=0).astype(o_ref.dtype)


# ----------------------------------------------------------------------------
# Per-generation VMEM sizing + tile picker.
# ----------------------------------------------------------------------------
def _tpu_vmem_capacity_bytes():
    try:
        info = pltpu.get_tpu_info()
        for attr in ("vmem_capacity_bytes", "vmem_bytes", "vmem_size_bytes"):
            val = getattr(info, attr, None)
            if val:
                return int(val)
    except Exception:
        pass
    return 64 << 20          # conservative: assume v7x-class per-core VMEM


def _pick_tile_rows(H, W, bytes_per_row, fixed_bytes, budget_bytes, max_rows_cap=64):
    """Largest divisor of H whose tile fits the budget and keeps the lane width
    (TH*W) a multiple of 128 (or the full spatial slab, which is always legal)."""
    avail = max(budget_bytes - fixed_bytes, bytes_per_row)
    max_rows = max(1, min(avail // max(bytes_per_row, 1),
                          max(1, 8192 // max(W, 1)),      # keep unrolls / tiles sane
                          max_rows_cap))
    divisors = [d for d in range(1, H + 1) if H % d == 0]
    valid = [d for d in divisors if (d * W) % 128 == 0 or d == H]
    fitting = [d for d in valid if d <= max_rows]
    return max(fitting) if fitting else min(valid)


# ----------------------------------------------------------------------------
# Parameter construction (deterministic).  Eval-mode BatchNorm folded into the
# 1x1 conv.  Weight layout: (Cout, Cin).
# ----------------------------------------------------------------------------
def make_branch_params(key, in_c, out_c, eps=1e-5):
    k_w, k_b, k_g, k_beta, k_m, k_v = jax.random.split(key, 6)
    w = jax.random.normal(k_w, (out_c, in_c), jnp.float32) * 0.1
    b = jax.random.normal(k_b, (out_c,), jnp.float32) * 0.1
    gamma = 1.0 + 0.1 * jax.random.normal(k_g, (out_c,), jnp.float32)
    beta = 0.1 * jax.random.normal(k_beta, (out_c,), jnp.float32)
    r_mean = 0.1 * jax.random.normal(k_m, (out_c,), jnp.float32)
    r_var = 1.0 + 0.1 * jnp.abs(jax.random.normal(k_v, (out_c,), jnp.float32))
    scale = gamma / jnp.sqrt(r_var + eps)
    return {"w": w * scale[:, None], "b": (b - r_mean) * scale + beta}


# ----------------------------------------------------------------------------
# BlockTypeA forward (public API is NCHW, like PyTorch).
# ----------------------------------------------------------------------------
@functools.partial(jax.jit, static_argnames=("upscale", "tile_rows"))
def block_type_a_forward(a_nchw, b_nchw, p_conv1, p_conv2, upscale=True, tile_rows=None):
    N, C1, H, W = a_nchw.shape
    Nb, C2, Hb, Wb = b_nchw.shape
    assert Nb == N
    C1out = p_conv2["w"].shape[0]     # conv2 acts on `a`
    C2out = p_conv1["w"].shape[0]     # conv1 acts on `b`
    Ctot = C1out + C2out

    # NCHW -> (N, C, H*W): contiguous reshape, no data movement.
    a_flat = a_nchw.reshape(N, C1, H * W)
    b_flat = b_nchw.reshape(N, C2, Hb * Wb)

    wa = p_conv2["w"]
    ba = p_conv2["b"].reshape(C1out, 1)
    wb = p_conv1["w"]
    bb = p_conv1["b"].reshape(C2out, 1)

    phys_vmem = _tpu_vmem_capacity_bytes()
    budget = min(max(phys_vmem // 5, 4 << 20), 24 << 20)   # per-step working-set budget

    out_shape = jax.ShapeDtypeStruct((N, Ctot, H * W), jnp.float32)

    if upscale:
        assert H == 2 * Hb and W == 2 * Wb, "upscale=True expects a at 2x b resolution"
        uh = jnp.asarray(bilinear_matrix(H, Hb))            # (H, Hb)
        uwT = jnp.asarray(bilinear_matrix(W, Wb).T)          # (Wb, W)

        bytes_per_row = 4 * (2 * C1 * W + 2 * Ctot * W + C1out * W
                             + 2 * C2out * W + C2out * Hb)
        fixed = 4 * (2 * C2 * Hb * Wb + 2 * Wb * W + 2 * H * Hb
                     + C2out * Hb * W + C2out * Hb * Wb
                     + 2 * (C1out * (C1 + 1) + C2out * (C2 + 1)))
        if tile_rows is None:
            TH = _pick_tile_rows(H, W, bytes_per_row, fixed, budget)
            if N == 1 and H // TH < 2:          # v7x megacore: give core 1 some work
                smaller = [d for d in range(1, H) if H % d == 0 and (d * W) % 128 == 0]
                if smaller:
                    TH = max(smaller)
        else:
            TH = int(tile_rows)
            assert H % TH == 0 and ((TH * W) % 128 == 0 or TH == H)
        n_h = H // TH
        P = 2 if (N == 1 and n_h >= 2 and n_h % 2 == 0) else 1
        h_inner = n_h // P

        est = fixed + TH * bytes_per_row
        vmem_limit = int(min(max(32 << 20, 2 * est), max(phys_vmem * 3 // 4, 32 << 20)))

        grid = (N, P, h_inner)
        in_specs = [
            pl.BlockSpec((1, C1, TH * W), lambda n, p, h: (n, 0, p * h_inner + h)),
            pl.BlockSpec((1, C2, Hb * Wb), lambda n, p, h: (n, 0, 0)),
            pl.BlockSpec((C1out, C1), lambda n, p, h: (0, 0)),
            pl.BlockSpec((C1out, 1), lambda n, p, h: (0, 0)),
            pl.BlockSpec((C2out, C2), lambda n, p, h: (0, 0)),
            pl.BlockSpec((C2out, 1), lambda n, p, h: (0, 0)),
            pl.BlockSpec((Wb, W), lambda n, p, h: (0, 0)),
            pl.BlockSpec((H, Hb), lambda n, p, h: (0, 0)),
        ]
        out_specs = pl.BlockSpec((1, Ctot, TH * W), lambda n, p, h: (n, 0, p * h_inner + h))

        kernel = functools.partial(_block_a_upscale_kernel, th=TH, h_inner=h_inner)
        out = pl.pallas_call(
            kernel,
            out_shape=out_shape,
            grid_spec=pltpu.PrefetchScalarGridSpec(
                num_scalar_prefetch=0, grid=grid,
                in_specs=in_specs, out_specs=out_specs,
                scratch_shapes=[pltpu.VMEM((C2out, Hb, W), jnp.float32)]),
            compiler_params=pltpu.CompilerParams(
                dimension_semantics=("parallel", "parallel", "arbitrary"),
                vmem_limit_bytes=vmem_limit),
        )(a_flat, b_flat, wa, ba, wb, bb, uwT, uh)
    else:
        assert (Hb, Wb) == (H, W), "upscale=False expects matching spatial dims"
        bytes_per_row = 4 * (2 * C1 * W + 2 * C2 * W + 2 * Ctot * W
                             + C1out * W + C2out * W + Ctot * W)
        fixed = 4 * 2 * (C1out * (C1 + 1) + C2out * (C2 + 1))
        if tile_rows is None:
            TH = _pick_tile_rows(H, W, bytes_per_row, fixed, budget)
            if N == 1 and H // TH < 2:
                smaller = [d for d in range(1, H) if H % d == 0 and (d * W) % 128 == 0]
                if smaller:
                    TH = max(smaller)
        else:
            TH = int(tile_rows)
            assert H % TH == 0 and ((TH * W) % 128 == 0 or TH == H)
        n_h = H // TH
        est = fixed + TH * bytes_per_row
        vmem_limit = int(min(max(32 << 20, 2 * est), max(phys_vmem * 3 // 4, 32 << 20)))

        grid = (N, n_h)
        in_specs = [
            pl.BlockSpec((1, C1, TH * W), lambda n, h: (n, 0, h)),
            pl.BlockSpec((1, C2, TH * W), lambda n, h: (n, 0, h)),
            pl.BlockSpec((C1out, C1), lambda n, h: (0, 0)),
            pl.BlockSpec((C1out, 1), lambda n, h: (0, 0)),
            pl.BlockSpec((C2out, C2), lambda n, h: (0, 0)),
            pl.BlockSpec((C2out, 1), lambda n, h: (0, 0)),
        ]
        out_specs = pl.BlockSpec((1, Ctot, TH * W), lambda n, h: (n, 0, h))
        out = pl.pallas_call(
            _block_a_noupscale_kernel,
            out_shape=out_shape,
            grid_spec=pltpu.PrefetchScalarGridSpec(
                num_scalar_prefetch=0, grid=grid,
                in_specs=in_specs, out_specs=out_specs),
            compiler_params=pltpu.CompilerParams(
                dimension_semantics=("parallel", "parallel"),
                vmem_limit_bytes=vmem_limit),
        )(a_flat, b_flat, wa, ba, wb, bb)

    # (N, Ctot, H*W) -> (N, Ctot, H, W): contiguous reshape, no data movement.
    return out.reshape(N, Ctot, H, W)


# ----------------------------------------------------------------------------
# Pure-JAX reference (same math, no Pallas) for the correctness check.
# ----------------------------------------------------------------------------
def reference_forward(a_nchw, b_nchw, p_conv1, p_conv2, upscale=True):
    def branch(x, p):
        y = jnp.einsum("oc,nchw->nohw", p["w"], x) + p["b"][None, :, None, None]
        return jnp.maximum(y, 0.0)

    A = branch(a_nchw, p_conv2)
    B = branch(b_nchw, p_conv1)
    if upscale:
        Hb, Wb = b_nchw.shape[2], b_nchw.shape[3]
        Uh = jnp.asarray(bilinear_matrix(2 * Hb, Hb))
        Uw = jnp.asarray(bilinear_matrix(2 * Wb, Wb))
        B = jnp.einsum("oh,nchw->ncow", Uh, B)
        B = jnp.einsum("pw,nchw->nchp", Uw, B)
    return jnp.concatenate([A, B], axis=1)


if __name__ == "__main__":
    key = jax.random.PRNGKey(0)
    k_a, k_b, k_b2, k_p1, k_p2 = jax.random.split(key, 5)

    # Shapes consistent with BlockTypeA(in_c1=4, in_c2=8, out_c1=8, out_c2=8):
    in_c1, in_c2, out_c1, out_c2 = 4, 8, 8, 8
    N, H, W = 2, 16, 16
    a = jax.random.normal(k_a, (N, in_c1, H, W), jnp.float32)
    b = jax.random.normal(k_b, (N, in_c2, H // 2, W // 2), jnp.float32)

    p_conv1 = make_branch_params(k_p1, in_c2, out_c2)   # applied to b
    p_conv2 = make_branch_params(k_p2, in_c1, out_c1)   # applied to a

    ref = reference_forward(a, b, p_conv1, p_conv2, upscale=True)

    # 1) default (auto-tiled) upscale path
    out = jax.block_until_ready(block_type_a_forward(a, b, p_conv1, p_conv2, upscale=True))
    assert out.shape == (N, out_c1 + out_c2, H, W), out.shape
    np.testing.assert_allclose(np.asarray(out), np.asarray(ref), rtol=1e-4, atol=1e-4)

    # 2) multi H-tile path (exercises the per-batch b-branch hoist across tiles)
    out_t = jax.block_until_ready(
        block_type_a_forward(a, b, p_conv1, p_conv2, upscale=True, tile_rows=8))
    np.testing.assert_allclose(np.asarray(out_t), np.asarray(ref), rtol=1e-4, atol=1e-4)

    # 3) N == 1 path (exercises the P=2 megacore split of the H axis)
    out_1 = jax.block_until_ready(
        block_type_a_forward(a[:1], b[:1], p_conv1, p_conv2, upscale=True, tile_rows=8))
    np.testing.assert_allclose(np.asarray(out_1), np.asarray(ref[:1]), rtol=1e-4, atol=1e-4)

    # 4) upscale=False path (a and b at matching resolution)
    b2 = jax.random.normal(k_b2, (N, in_c2, H, W), jnp.float32)
    out2 = jax.block_until_ready(block_type_a_forward(a, b2, p_conv1, p_conv2, upscale=False))
    ref2 = reference_forward(a, b2, p_conv1, p_conv2, upscale=False)
    np.testing.assert_allclose(np.asarray(out2), np.asarray(ref2), rtol=1e-4, atol=1e-4)

    print("KERNEL_OK")
</pallas_src>

<mosaic_0001>
module attributes {stable_mosaic.version = 11 : i64} {
  func.func @_block_a_upscale_kernel(%arg0: i32, %arg1: i32, %arg2: i32, %arg3: memref<1x4x256xf32, #tpu.memory_space<vmem>>, %arg4: memref<1x8x64xf32, #tpu.memory_space<vmem>>, %arg5: memref<8x4xf32, #tpu.memory_space<vmem>>, %arg6: memref<8x1xf32, #tpu.memory_space<vmem>>, %arg7: memref<8x8xf32, #tpu.memory_space<vmem>>, %arg8: memref<8x1xf32, #tpu.memory_space<vmem>>, %arg9: memref<8x16xf32, #tpu.memory_space<vmem>>, %arg10: memref<16x8xf32, #tpu.memory_space<vmem>>, %arg11: memref<1x16x256xf32, #tpu.memory_space<vmem>>, %arg12: memref<8x8x16xf32, #tpu.memory_space<vmem>>) attributes {dimension_semantics = [#tpu.dimension_semantics<parallel>, #tpu.dimension_semantics<parallel>, #tpu.dimension_semantics<arbitrary>], iteration_bounds = array<i64: 2, 1, 1>, scalar_prefetch = 0 : i64, scratch_operands = 1 : i64, tpu.core_type = #tpu.core_type<tc>, window_params = [{transform_indices = @transform_0, window_bounds = array<i64: 1, 4, 256>}, {transform_indices = @transform_1, window_bounds = array<i64: 1, 8, 64>}, {pipeline_mode = #tpu.pipeline_mode<synchronous>, transform_indices = @transform_2, window_bounds = array<i64: 8, 4>}, {pipeline_mode = #tpu.pipeline_mode<synchronous>, transform_indices = @transform_3, window_bounds = array<i64: 8, 1>}, {pipeline_mode = #tpu.pipeline_mode<synchronous>, transform_indices = @transform_4, window_bounds = array<i64: 8, 8>}, {pipeline_mode = #tpu.pipeline_mode<synchronous>, transform_indices = @transform_5, window_bounds = array<i64: 8, 1>}, {pipeline_mode = #tpu.pipeline_mode<synchronous>, transform_indices = @transform_6, window_bounds = array<i64: 8, 16>}, {pipeline_mode = #tpu.pipeline_mode<synchronous>, transform_indices = @transform_7, window_bounds = array<i64: 16, 8>}, {transform_indices = @transform_8, window_bounds = array<i64: 1, 16, 256>}]} {
    %c0_i32 = arith.constant 0 : i32
    %0 = arith.cmpi eq, %arg2, %c0_i32 : i32
    %1 = arith.extui %0 : i1 to i32
    %c0_i32_0 = arith.constant 0 : i32
    %2 = arith.cmpi ne, %1, %c0_i32_0 : i32
    scf.if %2 {
      %c0_48 = arith.constant 0 : index
      %c0_49 = arith.constant 0 : index
      %106 = vector.load %arg7[%c0_48, %c0_49] : memref<8x8xf32, #tpu.memory_space<vmem>>, vector<8x8xf32>
      %c0_50 = arith.constant 0 : index
      %c0_51 = arith.constant 0 : index
      %c0_52 = arith.constant 0 : index
      %107 = vector.load %arg4[%c0_50, %c0_51, %c0_52] : memref<1x8x64xf32, #tpu.memory_space<vmem>>, vector<1x8x64xf32>
      %108 = vector.shape_cast %107 : vector<1x8x64xf32> to vector<8x64xf32>
      %cst_53 = arith.constant dense<0.000000e+00> : vector<8x64xf32>
      %109 = tpu.matmul %106, %108, %cst_53 {dimension_numbers = #tpu.dot_dimension_numbers<[1], [0], [0], [1], [0, 0, 1, 1], [], []>} : vector<8x8xf32>, vector<8x64xf32>, vector<8x64xf32> -> vector<8x64xf32>
      %c0_54 = arith.constant 0 : index
      %c0_55 = arith.constant 0 : index
      %110 = vector.load %arg8[%c0_54, %c0_55] : memref<8x1xf32, #tpu.memory_space<vmem>>, vector<8x1xf32>
      %111 = vector.broadcast %110 : vector<8x1xf32> to vector<8x64xf32>
      %112 = arith.addf %109, %111 : vector<8x64xf32>
      %cst_56 = arith.constant 0.000000e+00 : f32
      %113 = vector.broadcast %cst_56 : f32 to vector<8x64xf32>
      %114 = arith.maximumf %112, %113 : vector<8x64xf32>
      %115 = vector.extract_strided_slice %114 {offsets = [0, 0], sizes = [8, 8], strides = [1, 1]} : vector<8x64xf32> to vector<8x8xf32>
      %c0_57 = arith.constant 0 : index
      %c0_58 = arith.constant 0 : index
      %116 = vector.load %arg9[%c0_57, %c0_58] : memref<8x16xf32, #tpu.memory_space<vmem>>, vector<8x16xf32>
      %cst_59 = arith.constant dense<0.000000e+00> : vector<8x16xf32>
      %117 = tpu.matmul %115, %116, %cst_59 {dimension_numbers = #tpu.dot_dimension_numbers<[1], [0], [0], [1], [0, 0, 1, 1], [], []>} : vector<8x8xf32>, vector<8x16xf32>, vector<8x16xf32> -> vector<8x16xf32>
      %c0_60 = arith.constant 0 : index
      %c0_61 = arith.constant 0 : index
      %c0_62 = arith.constant 0 : index
      %118 = vector.load %arg12[%c0_60, %c0_61, %c0_62] : memref<8x8x16xf32, #tpu.memory_space<vmem>>, vector<8x1x16xf32>
      %119 = vector.shape_cast %118 : vector<8x1x16xf32> to vector<8x16xf32>
      %120 = vector.shape_cast %117 : vector<8x16xf32> to vector<8x1x16xf32>
      tpu.vector_store %arg12[%c0_60, %c0_61, %c0_62], %120 {strides = array<i32>} : memref<8x8x16xf32, #tpu.memory_space<vmem>>, vector<8x1x16xf32>,
      %121 = vector.extract_strided_slice %114 {offsets = [0, 8], sizes = [8, 8], strides = [1, 1]} : vector<8x64xf32> to vector<8x8xf32>
      %c0_63 = arith.constant 0 : index
      %c0_64 = arith.constant 0 : index
      %122 = vector.load %arg9[%c0_63, %c0_64] : memref<8x16xf32, #tpu.memory_space<vmem>>, vector<8x16xf32>
      %cst_65 = arith.constant dense<0.000000e+00> : vector<8x16xf32>
      %123 = tpu.matmul %121, %122, %cst_65 {dimension_numbers = #tpu.dot_dimension_numbers<[1], [0], [0], [1], [0, 0, 1, 1], [], []>} : vector<8x8xf32>, vector<8x16xf32>, vector<8x16xf32> -> vector<8x16xf32>
      %c0_66 = arith.constant 0 : index
      %c1 = arith.constant 1 : index
      %c0_67 = arith.constant 0 : index
      %124 = vector.load %arg12[%c0_66, %c1, %c0_67] : memref<8x8x16xf32, #tpu.memory_space<vmem>>, vector<8x1x16xf32>
      %125 = vector.shape_cast %124 : vector<8x1x16xf32> to vector<8x16xf32>
      %126 = vector.shape_cast %123 : vector<8x16xf32> to vector<8x1x16xf32>
      tpu.vector_store %arg12[%c0_66, %c1, %c0_67], %126 {strides = array<i32>} : memref<8x8x16xf32, #tpu.memory_space<vmem>>, vector<8x1x16xf32>,
      %127 = vector.extract_strided_slice %114 {offsets = [0, 16], sizes = [8, 8], strides = [1, 1]} : vector<8x64xf32> to vector<8x8xf32>
      %c0_68 = arith.constant 0 : index
      %c0_69 = arith.constant 0 : index
      %128 = vector.load %arg9[%c0_68, %c0_69] : memref<8x16xf32, #tpu.memory_space<vmem>>, vector<8x16xf32>
      %cst_70 = arith.constant dense<0.000000e+00> : vector<8x16xf32>
      %129 = tpu.matmul %127, %128, %cst_70 {dimension_numbers = #tpu.dot_dimension_numbers<[1], [0], [0], [1], [0, 0, 1, 1], [], []>} : vector<8x8xf32>, vector<8x16xf32>, vector<8x16xf32> -> vector<8x16xf32>
      %c0_71 = arith.constant 0 : index
      %c2 = arith.constant 2 : index
      %c0_72 = arith.constant 0 : index
      %130 = vector.load %arg12[%c0_71, %c2, %c0_72] : memref<8x8x16xf32, #tpu.memory_space<vmem>>, vector<8x1x16xf32>
      %131 = vector.shape_cast %130 : vector<8x1x16xf32> to vector<8x16xf32>
      %132 = vector.shape_cast %129 : vector<8x16xf32> to vector<8x1x16xf32>
      tpu.vector_store %arg12[%c0_71, %c2, %c0_72], %132 {strides = array<i32>} : memref<8x8x16xf32, #tpu.memory_space<vmem>>, vector<8x1x16xf32>,
      %133 = vector.extract_strided_slice %114 {offsets = [0, 24], sizes = [8, 8], strides = [1, 1]} : vector<8x64xf32> to vector<8x8xf32>
      %c0_73 = arith.constant 0 : index
      %c0_74 = arith.constant 0 : index
      %134 = vector.load %arg9[%c0_73, %c0_74] : memref<8x16xf32, #tpu.memory_space<vmem>>, vector<8x16xf32>
      %cst_75 = arith.constant dense<0.000000e+00> : vector<8x16xf32>
      %135 = tpu.matmul %133, %134, %cst_75 {dimension_numbers = #tpu.dot_dimension_numbers<[1], [0], [0], [1], [0, 0, 1, 1], [], []>} : vector<8x8xf32>, vector<8x16xf32>, vector<8x16xf32> -> vector<8x16xf32>
      %c0_76 = arith.constant 0 : index
      %c3 = arith.constant 3 : index
      %c0_77 = arith.constant 0 : index
      %136 = vector.load %arg12[%c0_76, %c3, %c0_77] : memref<8x8x16xf32, #tpu.memory_space<vmem>>, vector<8x1x16xf32>
      %137 = vector.shape_cast %136 : vector<8x1x16xf32> to vector<8x16xf32>
      %138 = vector.shape_cast %135 : vector<8x16xf32> to vector<8x1x16xf32>
      tpu.vector_store %arg12[%c0_76, %c3, %c0_77], %138 {strides = array<i32>} : memref<8x8x16xf32, #tpu.memory_space<vmem>>, vector<8x1x16xf32>,
      %139 = vector.extract_strided_slice %114 {offsets = [0, 32], sizes = [8, 8], strides = [1, 1]} : vector<8x64xf32> to vector<8x8xf32>
      %c0_78 = arith.constant 0 : index
      %c0_79 = arith.constant 0 : index
      %140 = vector.load %arg9[%c0_78, %c0_79] : memref<8x16xf32, #tpu.memory_space<vmem>>, vector<8x16xf32>
      %cst_80 = arith.constant dense<0.000000e+00> : vector<8x16xf32>
      %141 = tpu.matmul %139, %140, %cst_80 {dimension_numbers = #tpu.dot_dimension_numbers<[1], [0], [0], [1], [0, 0, 1, 1], [], []>} : vector<8x8xf32>, vector<8x16xf32>, vector<8x16xf32> -> vector<8x16xf32>
      %c0_81 = arith.constant 0 : index
      %c4 = arith.constant 4 : index
      %c0_82 = arith.constant 0 : index
      %142 = vector.load %arg12[%c0_81, %c4, %c0_82] : memref<8x8x16xf32, #tpu.memory_space<vmem>>, vector<8x1x16xf32>
      %143 = vector.shape_cast %142 : vector<8x1x16xf32> to vector<8x16xf32>
      %144 = vector.shape_cast %141 : vector<8x16xf32> to vector<8x1x16xf32>
      tpu.vector_store %arg12[%c0_81, %c4, %c0_82], %144 {strides = array<i32>} : memref<8x8x16xf32, #tpu.memory_space<vmem>>, vector<8x1x16xf32>,
      %145 = vector.extract_strided_slice %114 {offsets = [0, 40], sizes = [8, 8], strides = [1, 1]} : vector<8x64xf32> to vector<8x8xf32>
      %c0_83 = arith.constant 0 : index
      %c0_84 = arith.constant 0 : index
      %146 = vector.load %arg9[%c0_83, %c0_84] : memref<8x16xf32, #tpu.memory_space<vmem>>, vector<8x16xf32>
      %cst_85 = arith.constant dense<0.000000e+00> : vector<8x16xf32>
      %147 = tpu.matmul %145, %146, %cst_85 {dimension_numbers = #tpu.dot_dimension_numbers<[1], [0], [0], [1], [0, 0, 1, 1], [], []>} : vector<8x8xf32>, vector<8x16xf32>, vector<8x16xf32> -> vector<8x16xf32>
      %c0_86 = arith.constant 0 : index
      %c5 = arith.constant 5 : index
      %c0_87 = arith.constant 0 : index
      %148 = vector.load %arg12[%c0_86, %c5, %c0_87] : memref<8x8x16xf32, #tpu.memory_space<vmem>>, vector<8x1x16xf32>
      %149 = vector.shape_cast %148 : vector<8x1x16xf32> to vector<8x16xf32>
      %150 = vector.shape_cast %147 : vector<8x16xf32> to vector<8x1x16xf32>
      tpu.vector_store %arg12[%c0_86, %c5, %c0_87], %150 {strides = array<i32>} : memref<8x8x16xf32, #tpu.memory_space<vmem>>, vector<8x1x16xf32>,
      %151 = vector.extract_strided_slice %114 {offsets = [0, 48], sizes = [8, 8], strides = [1, 1]} : vector<8x64xf32> to vector<8x8xf32>
      %c0_88 = arith.constant 0 : index
      %c0_89 = arith.constant 0 : index
      %152 = vector.load %arg9[%c0_88, %c0_89] : memref<8x16xf32, #tpu.memory_space<vmem>>, vector<8x16xf32>
      %cst_90 = arith.constant dense<0.000000e+00> : vector<8x16xf32>
      %153 = tpu.matmul %151, %152, %cst_90 {dimension_numbers = #tpu.dot_dimension_numbers<[1], [0], [0], [1], [0, 0, 1, 1], [], []>} : vector<8x8xf32>, vector<8x16xf32>, vector<8x16xf32> -> vector<8x16xf32>
      %c0_91 = arith.constant 0 : index
      %c6 = arith.constant 6 : index
      %c0_92 = arith.constant 0 : index
      %154 = vector.load %arg12[%c0_91, %c6, %c0_92] : memref<8x8x16xf32, #tpu.memory_space<vmem>>, vector<8x1x16xf32>
      %155 = vector.shape_cast %154 : vector<8x1x16xf32> to vector<8x16xf32>
      %156 = vector.shape_cast %153 : vector<8x16xf32> to vector<8x1x16xf32>
      tpu.vector_store %arg12[%c0_91, %c6, %c0_92], %156 {strides = array<i32>} : memref<8x8x16xf32, #tpu.memory_space<vmem>>, vector<8x1x16xf32>,
      %157 = vector.extract_strided_slice %114 {offsets = [0, 56], sizes = [8, 8], strides = [1, 1]} : vector<8x64xf32> to vector<8x8xf32>
      %c0_93 = arith.constant 0 : index
      %c0_94 = arith.constant 0 : index
      %158 = vector.load %arg9[%c0_93, %c0_94] : memref<8x16xf32, #tpu.memory_space<vmem>>, vector<8x16xf32>
      %cst_95 = arith.constant dense<0.000000e+00> : vector<8x16xf32>
      %159 = tpu.matmul %157, %158, %cst_95 {dimension_numbers = #tpu.dot_dimension_numbers<[1], [0], [0], [1], [0, 0, 1, 1], [], []>} : vector<8x8xf32>, vector<8x16xf32>, vector<8x16xf32> -> vector<8x16xf32>
      %c0_96 = arith.constant 0 : index
      %c7 = arith.constant 7 : index
      %c0_97 = arith.constant 0 : index
      %160 = vector.load %arg12[%c0_96, %c7, %c0_97] : memref<8x8x16xf32, #tpu.memory_space<vmem>>, vector<8x1x16xf32>
      %161 = vector.shape_cast %160 : vector<8x1x16xf32> to vector<8x16xf32>
      %162 = vector.shape_cast %159 : vector<8x16xf32> to vector<8x1x16xf32>
      tpu.vector_store %arg12[%c0_96, %c7, %c0_97], %162 {strides = array<i32>} : memref<8x8x16xf32, #tpu.memory_space<vmem>>, vector<8x1x16xf32>,
    } else {
    }
    %c0 = arith.constant 0 : index
    %c0_1 = arith.constant 0 : index
    %3 = vector.load %arg5[%c0, %c0_1] : memref<8x4xf32, #tpu.memory_space<vmem>>, vector<8x4xf32>
    %c0_2 = arith.constant 0 : index
    %c0_3 = arith.constant 0 : index
    %c0_4 = arith.constant 0 : index
    %4 = vector.load %arg3[%c0_2, %c0_3, %c0_4] : memref<1x4x256xf32, #tpu.memory_space<vmem>>, vector<1x4x256xf32>
    %5 = vector.shape_cast %4 : vector<1x4x256xf32> to vector<4x256xf32>
    %cst = arith.constant dense<0.000000e+00> : vector<8x256xf32>
    %6 = tpu.matmul %3, %5, %cst {dimension_numbers = #tpu.dot_dimension_numbers<[1], [0], [0], [1], [0, 0, 1, 1], [], []>} : vector<8x4xf32>, vector<4x256xf32>, vector<8x256xf32> -> vector<8x256xf32>
    %c0_5 = arith.constant 0 : index
    %c0_6 = arith.constant 0 : index
    %7 = vector.load %arg6[%c0_5, %c0_6] : memref<8x1xf32, #tpu.memory_space<vmem>>, vector<8x1xf32>
    %8 = vector.broadcast %7 : vector<8x1xf32> to vector<8x256xf32>
    %9 = arith.addf %6, %8 : vector<8x256xf32>
    %cst_7 = arith.constant 0.000000e+00 : f32
    %10 = vector.broadcast %cst_7 : f32 to vector<8x256xf32>
    %11 = arith.maximumf %9, %10 : vector<8x256xf32>
    %c0_8 = arith.constant 0 : index
    %c0_9 = arith.constant 0 : index
    %c0_10 = arith.constant 0 : index
    %12 = vector.load %arg11[%c0_8, %c0_9, %c0_10] : memref<1x16x256xf32, #tpu.memory_space<vmem>>, vector<1x8x256xf32>
    %13 = vector.shape_cast %12 : vector<1x8x256xf32> to vector<8x256xf32>
    %14 = vector.shape_cast %11 : vector<8x256xf32> to vector<1x8x256xf32>
    tpu.vector_store %arg11[%c0_8, %c0_9, %c0_10], %14 {strides = array<i32>} : memref<1x16x256xf32, #tpu.memory_space<vmem>>, vector<1x8x256xf32>,
    %c1_i32 = arith.constant 1 : i32
    %15 = arith.muli %arg1, %c1_i32 : i32
    %16 = arith.addi %15, %arg2 : i32
    %c16_i32 = arith.constant 16 : i32
    %17 = arith.muli %16, %c16_i32 : i32
    %18 = tpu.assume_multiple %17, 8 : i32
    %19 = arith.index_cast %18 : i32 to index
    %c0_11 = arith.constant 0 : index
    %20 = vector.load %arg10[%19, %c0_11] : memref<16x8xf32, #tpu.memory_space<vmem>>, vector<16x8xf32>
    %21 = vector.shape_cast %20 : vector<16x8xf32> to vector<1x16x8xf32>
    %22 = vector.shape_cast %21 : vector<1x16x8xf32> to vector<1x16x8xf32>
    %23 = vector.broadcast %22 : vector<1x16x8xf32> to vector<8x16x8xf32>
    %c0_12 = arith.constant 0 : index
    %c0_13 = arith.constant 0 : index
    %c0_14 = arith.constant 0 : index
    %24 = vector.load %arg12[%c0_12, %c0_13, %c0_14] : memref<8x8x16xf32, #tpu.memory_space<vmem>>, vector<8x8x16xf32>
    "tpu.trace_start"() <{level = 10 : i32, message = "cth,chw->ctw"}> : () -> ()
    %cst_15 = arith.constant dense<0.000000e+00> : vector<8x16x16xf32>
    %25 = tpu.matmul %23, %24, %cst_15 {dimension_numbers = #tpu.dot_dimension_numbers<[2], [1], [1], [2], [0, 0, 0, 1, 1, 2], [0], [0]>} : vector<8x16x8xf32>, vector<8x8x16xf32>, vector<8x16x16xf32> -> vector<8x16x16xf32>
    "tpu.trace_stop"() : () -> ()
    %26 = vector.extract_strided_slice %25 {offsets = [0, 0, 0], sizes = [8, 1, 16], strides = [1, 1, 1]} : vector<8x16x16xf32> to vector<8x1x16xf32>
    %27 = vector.shape_cast %26 : vector<8x1x16xf32> to vector<8x16xf32>
    %c0_16 = arith.constant 0 : index
    %c8 = arith.constant 8 : index
    %c0_17 = arith.constant 0 : index
    %28 = vector.load %arg11[%c0_16, %c8, %c0_17] : memref<1x16x256xf32, #tpu.memory_space<vmem>>, vector<1x8x16xf32>
    %29 = vector.shape_cast %28 : vector<1x8x16xf32> to vector<8x16xf32>
    %30 = vector.shape_cast %27 : vector<8x16xf32> to vector<1x8x16xf32>
    tpu.vector_store %arg11[%c0_16, %c8, %c0_17], %30 {strides = array<i32>} : memref<1x16x256xf32, #tpu.memory_space<vmem>>, vector<1x8x16xf32>,
    %31 = vector.extract_strided_slice %25 {offsets = [0, 1, 0], sizes = [8, 1, 16], strides = [1, 1, 1]} : vector<8x16x16xf32> to vector<8x1x16xf32>
    %32 = vector.shape_cast %31 : vector<8x1x16xf32> to vector<8x16xf32>
    %c0_18 = arith.constant 0 : index
    %c8_19 = arith.constant 8 : index
    %c16 = arith.constant 16 : index
    %33 = vector.load %arg11[%c0_18, %c8_19, %c16] : memref<1x16x256xf32, #tpu.memory_space<vmem>>, vector<1x8x16xf32>
    %34 = vector.shape_cast %33 : vector<1x8x16xf32> to vector<8x16xf32>
    %35 = vector.shape_cast %32 : vector<8x16xf32> to vector<1x8x16xf32>
    tpu.vector_store %arg11[%c0_18, %c8_19, %c16], %35 {strides = array<i32>} : memref<1x16x256xf32, #tpu.memory_space<vmem>>, vector<1x8x16xf32>,
    %36 = vector.extract_strided_slice %25 {offsets = [0, 2, 0], sizes = [8, 1, 16], strides = [1, 1, 1]} : vector<8x16x16xf32> to vector<8x1x16xf32>
    %37 = vector.shape_cast %36 : vector<8x1x16xf32> to vector<8x16xf32>
    %c0_20 = arith.constant 0 : index
    %c8_21 = arith.constant 8 : index
    %c32 = arith.constant 32 : index
    %38 = vector.load %arg11[%c0_20, %c8_21, %c32] : memref<1x16x256xf32, #tpu.memory_space<vmem>>, vector<1x8x16xf32>
    %39 = vector.shape_cast %38 : vector<1x8x16xf32> to vector<8x16xf32>
    %40 = vector.shape_cast %37 : vector<8x16xf32> to vector<1x8x16xf32>
    tpu.vector_store %arg11[%c0_20, %c8_21, %c32], %40 {strides = array<i32>} : memref<1x16x256xf32, #tpu.memory_space<vmem>>, vector<1x8x16xf32>,
    %41 = vector.extract_strided_slice %25 {offsets = [0, 3, 0], sizes = [8, 1, 16], strides = [1, 1, 1]} : vector<8x16x16xf32> to vector<8x1x16xf32>
    %42 = vector.shape_cast %41 : vector<8x1x16xf32> to vector<8x16xf32>
    %c0_22 = arith.constant 0 : index
    %c8_23 = arith.constant 8 : index
    %c48 = arith.constant 48 : index
    %43 = vector.load %arg11[%c0_22, %c8_23, %c48] : memref<1x16x256xf32, #tpu.memory_space<vmem>>, vector<1x8x16xf32>
    %44 = vector.shape_cast %43 : vector<1x8x16xf32> to vector<8x16xf32>
    %45 = vector.shape_cast %42 : vector<8x16xf32> to vector<1x8x16xf32>
    tpu.vector_store %arg11[%c0_22, %c8_23, %c48], %45 {strides = array<i32>} : memref<1x16x256xf32, #tpu.memory_space<vmem>>, vector<1x8x16xf32>,
    %46 = vector.extract_strided_slice %25 {offsets = [0, 4, 0], sizes = [8, 1, 16], strides = [1, 1, 1]} : vector<8x16x16xf32> to vector<8x1x16xf32>
    %47 = vector.shape_cast %46 : vector<8x1x16xf32> to vector<8x16xf32>
    %c0_24 = arith.constant 0 : index
    %c8_25 = arith.constant 8 : index
    %c64 = arith.constant 64 : index
    %48 = vector.load %arg11[%c0_24, %c8_25, %c64] : memref<1x16x256xf32, #tpu.memory_space<vmem>>, vector<1x8x16xf32>
    %49 = vector.shape_cast %48 : vector<1x8x16xf32> to vector<8x16xf32>
    %50 = vector.shape_cast %47 : vector<8x16xf32> to vector<1x8x16xf32>
    tpu.vector_store %arg11[%c0_24, %c8_25, %c64], %50 {strides = array<i32>} : memref<1x16x256xf32, #tpu.memory_space<vmem>>, vector<1x8x16xf32>,
    %51 = vector.extract_strided_slice %25 {offsets = [0, 5, 0], sizes = [8, 1, 16], strides = [1, 1, 1]} : vector<8x16x16xf32> to vector<8x1x16xf32>
    %52 = vector.shape_cast %51 : vector<8x1x16xf32> to vector<8x16xf32>
    %c0_26 = arith.constant 0 : index
    %c8_27 = arith.constant 8 : index
    %c80 = arith.constant 80 : index
    %53 = vector.load %arg11[%c0_26, %c8_27, %c80] : memref<1x16x256xf32, #tpu.memory_space<vmem>>, vector<1x8x16xf32>
    %54 = vector.shape_cast %53 : vector<1x8x16xf32> to vector<8x16xf32>
    %55 = vector.shape_cast %52 : vector<8x16xf32> to vector<1x8x16xf32>
    tpu.vector_store %arg11[%c0_26, %c8_27, %c80], %55 {strides = array<i32>} : memref<1x16x256xf32, #tpu.memory_space<vmem>>, vector<1x8x16xf32>,
    %56 = vector.extract_strided_slice %25 {offsets = [0, 6, 0], sizes = [8, 1, 16], strides = [1, 1, 1]} : vector<8x16x16xf32> to vector<8x1x16xf32>
    %57 = vector.shape_cast %56 : vector<8x1x16xf32> to vector<8x16xf32>
    %c0_28 = arith.constant 0 : index
    %c8_29 = arith.constant 8 : index
    %c96 = arith.constant 96 : index
    %58 = vector.load %arg11[%c0_28, %c8_29, %c96] : memref<1x16x256xf32, #tpu.memory_space<vmem>>, vector<1x8x16xf32>
    %59 = vector.shape_cast %58 : vector<1x8x16xf32> to vector<8x16xf32>
    %60 = vector.shape_cast %57 : vector<8x16xf32> to vector<1x8x16xf32>
    tpu.vector_store %arg11[%c0_28, %c8_29, %c96], %60 {strides = array<i32>} : memref<1x16x256xf32, #tpu.memory_space<vmem>>, vector<1x8x16xf32>,
    %61 = vector.extract_strided_slice %25 {offsets = [0, 7, 0], sizes = [8, 1, 16], strides = [1, 1, 1]} : vector<8x16x16xf32> to vector<8x1x16xf32>
    %62 = vector.shape_cast %61 : vector<8x1x16xf32> to vector<8x16xf32>
    %c0_30 = arith.constant 0 : index
    %c8_31 = arith.constant 8 : index
    %c112 = arith.constant 112 : index
    %63 = vector.load %arg11[%c0_30, %c8_31, %c112] : memref<1x16x256xf32, #tpu.memory_space<vmem>>, vector<1x8x16xf32>
    %64 = vector.shape_cast %63 : vector<1x8x16xf32> to vector<8x16xf32>
    %65 = vector.shape_cast %62 : vector<8x16xf32> to vector<1x8x16xf32>
    tpu.vector_store %arg11[%c0_30, %c8_31, %c112], %65 {strides = array<i32>} : memref<1x16x256xf32, #tpu.memory_space<vmem>>, vector<1x8x16xf32>,
    %66 = vector.extract_strided_slice %25 {offsets = [0, 8, 0], sizes = [8, 1, 16], strides = [1, 1, 1]} : vector<8x16x16xf32> to vector<8x1x16xf32>
    %67 = vector.shape_cast %66 : vector<8x1x16xf32> to vector<8x16xf32>
    %c0_32 = arith.constant 0 : index
    %c8_33 = arith.constant 8 : index
    %c128 = arith.constant 128 : index
    %68 = vector.load %arg11[%c0_32, %c8_33, %c128] : memref<1x16x256xf32, #tpu.memory_space<vmem>>, vector<1x8x16xf32>
    %69 = vector.shape_cast %68 : vector<1x8x16xf32> to vector<8x16xf32>
    %70 = vector.shape_cast %67 : vector<8x16xf32> to vector<1x8x16xf32>
    tpu.vector_store %arg11[%c0_32, %c8_33, %c128], %70 {strides = array<i32>} : memref<1x16x256xf32, #tpu.memory_space<vmem>>, vector<1x8x16xf32>,
    %71 = vector.extract_strided_slice %25 {offsets = [0, 9, 0], sizes = [8, 1, 16], strides = [1, 1, 1]} : vector<8x16x16xf32> to vector<8x1x16xf32>
    %72 = vector.shape_cast %71 : vector<8x1x16xf32> to vector<8x16xf32>
    %c0_34 = arith.constant 0 : index
    %c8_35 = arith.constant 8 : index
    %c144 = arith.constant 144 : index
    %73 = vector.load %arg11[%c0_34, %c8_35, %c144] : memref<1x16x256xf32, #tpu.memory_space<vmem>>, vector<1x8x16xf32>
    %74 = vector.shape_cast %73 : vector<1x8x16xf32> to vector<8x16xf32>
    %75 = vector.shape_cast %72 : vector<8x16xf32> to vector<1x8x16xf32>
    tpu.vector_store %arg11[%c0_34, %c8_35, %c144], %75 {strides = array<i32>} : memref<1x16x256xf32, #tpu.memory_space<vmem>>, vector<1x8x16xf32>,
    %76 = vector.extract_strided_slice %25 {offsets = [0, 10, 0], sizes = [8, 1, 16], strides = [1, 1, 1]} : vector<8x16x16xf32> to vector<8x1x16xf32>
    %77 = vector.shape_cast %76 : vector<8x1x16xf32> to vector<8x16xf32>
    %c0_36 = arith.constant 0 : index
    %c8_37 = arith.constant 8 : index
    %c160 = arith.constant 160 : index
    %78 = vector.load %arg11[%c0_36, %c8_37, %c160] : memref<1x16x256xf32, #tpu.memory_space<vmem>>, vector<1x8x16xf32>
    %79 = vector.shape_cast %78 : vector<1x8x16xf32> to vector<8x16xf32>
    %80 = vector.shape_cast %77 : vector<8x16xf32> to vector<1x8x16xf32>
    tpu.vector_store %arg11[%c0_36, %c8_37, %c160], %80 {strides = array<i32>} : memref<1x16x256xf32, #tpu.memory_space<vmem>>, vector<1x8x16xf32>,
    %81 = vector.extract_strided_slice %25 {offsets = [0, 11, 0], sizes = [8, 1, 16], strides = [1, 1, 1]} : vector<8x16x16xf32> to vector<8x1x16xf32>
    %82 = vector.shape_cast %81 : vector<8x1x16xf32> to vector<8x16xf32>
    %c0_38 = arith.constant 0 : index
    %c8_39 = arith.constant 8 : index
    %c176 = arith.constant 176 : index
    %83 = vector.load %arg11[%c0_38, %c8_39, %c176] : memref<1x16x256xf32, #tpu.memory_space<vmem>>, vector<1x8x16xf32>
    %84 = vector.shape_cast %83 : vector<1x8x16xf32> to vector<8x16xf32>
    %85 = vector.shape_cast %82 : vector<8x16xf32> to vector<1x8x16xf32>
    tpu.vector_store %arg11[%c0_38, %c8_39, %c176], %85 {strides = array<i32>} : memref<1x16x256xf32, #tpu.memory_space<vmem>>, vector<1x8x16xf32>,
    %86 = vector.extract_strided_slice %25 {offsets = [0, 12, 0], sizes = [8, 1, 16], strides = [1, 1, 1]} : vector<8x16x16xf32> to vector<8x1x16xf32>
    %87 = vector.shape_cast %86 : vector<8x1x16xf32> to vector<8x16xf32>
    %c0_40 = arith.constant 0 : index
    %c8_41 = arith.constant 8 : index
    %c192 = arith.constant 192 : index
    %88 = vector.load %arg11[%c0_40, %c8_41, %c192] : memref<1x16x256xf32, #tpu.memory_space<vmem>>, vector<1x8x16xf32>
    %89 = vector.shape_cast %88 : vector<1x8x16xf32> to vector<8x16xf32>
    %90 = vector.shape_cast %87 : vector<8x16xf32> to vector<1x8x16xf32>
    tpu.vector_store %arg11[%c0_40, %c8_41, %c192], %90 {strides = array<i32>} : memref<1x16x256xf32, #tpu.memory_space<vmem>>, vector<1x8x16xf32>,
    %91 = vector.extract_strided_slice %25 {offsets = [0, 13, 0], sizes = [8, 1, 16], strides = [1, 1, 1]} : vector<8x16x16xf32> to vector<8x1x16xf32>
    %92 = vector.shape_cast %91 : vector<8x1x16xf32> to vector<8x16xf32>
    %c0_42 = arith.constant 0 : index
    %c8_43 = arith.constant 8 : index
    %c208 = arith.constant 208 : index
    %93 = vector.load %arg11[%c0_42, %c8_43, %c208] : memref<1x16x256xf32, #tpu.memory_space<vmem>>, vector<1x8x16xf32>
    %94 = vector.shape_cast %93 : vector<1x8x16xf32> to vector<8x16xf32>
    %95 = vector.shape_cast %92 : vector<8x16xf32> to vector<1x8x16xf32>
    tpu.vector_store %arg11[%c0_42, %c8_43, %c208], %95 {strides = array<i32>} : memref<1x16x256xf32, #tpu.memory_space<vmem>>, vector<1x8x16xf32>,
    %96 = vector.extract_strided_slice %25 {offsets = [0, 14, 0], sizes = [8, 1, 16], strides = [1, 1, 1]} : vector<8x16x16xf32> to vector<8x1x16xf32>
    %97 = vector.shape_cast %96 : vector<8x1x16xf32> to vector<8x16xf32>
    %c0_44 = arith.constant 0 : index
    %c8_45 = arith.constant 8 : index
    %c224 = arith.constant 224 : index
    %98 = vector.load %arg11[%c0_44, %c8_45, %c224] : memref<1x16x256xf32, #tpu.memory_space<vmem>>, vector<1x8x16xf32>
    %99 = vector.shape_cast %98 : vector<1x8x16xf32> to vector<8x16xf32>
    %100 = vector.shape_cast %97 : vector<8x16xf32> to vector<1x8x16xf32>
    tpu.vector_store %arg11[%c0_44, %c8_45, %c224], %100 {strides = array<i32>} : memref<1x16x256xf32, #tpu.memory_space<vmem>>, vector<1x8x16xf32>,
    %101 = vector.extract_strided_slice %25 {offsets = [0, 15, 0], sizes = [8, 1, 16], strides = [1, 1, 1]} : vector<8x16x16xf32> to vector<8x1x16xf32>
    %102 = vector.shape_cast %101 : vector<8x1x16xf32> to vector<8x16xf32>
    %c0_46 = arith.constant 0 : index
    %c8_47 = arith.constant 8 : index
    %c240 = arith.constant 240 : index
    %103 = vector.load %arg11[%c0_46, %c8_47, %c240] : memref<1x16x256xf32, #tpu.memory_space<vmem>>, vector<1x8x16xf32>
    %104 = vector.shape_cast %103 : vector<1x8x16xf32> to vector<8x16xf32>
    %105 = vector.shape_cast %102 : vector<8x16xf32> to vector<1x8x16xf32>
    tpu.vector_store %arg11[%c0_46, %c8_47, %c240], %105 {strides = array<i32>} : memref<1x16x256xf32, #tpu.memory_space<vmem>>, vector<1x8x16xf32>,
    return
  }
  func.func @transform_0(%arg0: i32, %arg1: i32, %arg2: i32) -> (i32, i32, i32) {
    %c1_i32 = arith.constant 1 : i32
    %0 = arith.muli %arg1, %c1_i32 : i32
    %1 = arith.addi %0, %arg2 : i32
    %c0_i32 = arith.constant 0 : i32
    %c0_i32_0 = arith.constant 0 : i32
    return %arg0, %c0_i32, %1 : i32, i32, i32
  }
  func.func @transform_1(%arg0: i32, %arg1: i32, %arg2: i32) -> (i32, i32, i32) {
    %c0_i32 = arith.constant 0 : i32
    %c0_i32_0 = arith.constant 0 : i32
    %c0_i32_1 = arith.constant 0 : i32
    return %arg0, %c0_i32, %c0_i32_0 : i32, i32, i32
  }
  func.func @transform_2(%arg0: i32, %arg1: i32, %arg2: i32) -> (i32, i32) {
    %c0_i32 = arith.constant 0 : i32
    %c0_i32_0 = arith.constant 0 : i32
    %c0_i32_1 = arith.constant 0 : i32
    return %c0_i32, %c0_i32_0 : i32, i32
  }
  func.func @transform_3(%arg0: i32, %arg1: i32, %arg2: i32) -> (i32, i32) {
    %c0_i32 = arith.constant 0 : i32
    %c0_i32_0 = arith.constant 0 : i32
    %c0_i32_1 = arith.constant 0 : i32
    return %c0_i32, %c0_i32_0 : i32, i32
  }
  func.func @transform_4(%arg0: i32, %arg1: i32, %arg2: i32) -> (i32, i32) {
    %c0_i32 = arith.constant 0 : i32
    %c0_i32_0 = arith.constant 0 : i32
    %c0_i32_1 = arith.constant 0 : i32
    return %c0_i32, %c0_i32_0 : i32, i32
  }
  func.func @transform_5(%arg0: i32, %arg1: i32, %arg2: i32) -> (i32, i32) {
    %c0_i32 = arith.constant 0 : i32
    %c0_i32_0 = arith.constant 0 : i32
    %c0_i32_1 = arith.constant 0 : i32
    return %c0_i32, %c0_i32_0 : i32, i32
  }
  func.func @transform_6(%arg0: i32, %arg1: i32, %arg2: i32) -> (i32, i32) {
    %c0_i32 = arith.constant 0 : i32
    %c0_i32_0 = arith.constant 0 : i32
    %c0_i32_1 = arith.constant 0 : i32
    return %c0_i32, %c0_i32_0 : i32, i32
  }
  func.func @transform_7(%arg0: i32, %arg1: i32, %arg2: i32) -> (i32, i32) {
    %c0_i32 = arith.constant 0 : i32
    %c0_i32_0 = arith.constant 0 : i32
    %c0_i32_1 = arith.constant 0 : i32
    return %c0_i32, %c0_i32_0 : i32, i32
  }
  func.func @transform_8(%arg0: i32, %arg1: i32, %arg2: i32) -> (i32, i32, i32) {
    %c1_i32 = arith.constant 1 : i32
    %0 = arith.muli %arg1, %c1_i32 : i32
    %1 = arith.addi %0, %arg2 : i32
    %c0_i32 = arith.constant 0 : i32
    %c0_i32_0 = arith.constant 0 : i32
    return %arg0, %c0_i32, %1 : i32, i32, i32
  }
}

</mosaic_0001>

<bundles_post_ra>
// kernel: block_type_a_forward.1
= control target key start
LH: loop header
LB: loop body
LE: loop exit
PB: predicated region body
PF: predicated region fallthrough
CT: control target
= control target key end

     0   :  { %s3027_s27 = smov 0   ;;  %s3029_s28 = smov 0   ;;  %s3608_s0 = inlined_call_operand.vmem [shape: f32[2,4,256], index: 0, kind: input, shape index: {}]   ;;  %s3609_s1 = inlined_call_operand.vmem [shape: f32[2,8,64], index: 1, kind: input, shape index: {}]   ;;  %s3610_s2 = inlined_call_operand.vmem [shape: f32[8,4], index: 2, kind: input, shape index: {}]   ;;  %s3611_s3 = inlined_call_operand.vmem [shape: f32[8,1], index: 3, kind: input, shape index: {}]   ;;  %s3612_s4 = inlined_call_operand.vmem [shape: f32[8,8], index: 4, kind: input, shape index: {}]   ;;  %s3613_s5 = inlined_call_operand.vmem [shape: f32[8,1], index: 5, kind: input, shape index: {}]   ;;  %s3614_s6 = inlined_call_operand.vmem [shape: f32[8,16], index: 6, kind: input, shape index: {}]   ;;  %s3615_s7 = inlined_call_operand.vmem [shape: f32[16,8], index: 7, kind: input, shape index: {}]   ;;  %s3616_s8 = inlined_call_operand.vmem [shape: f32[2,16,256], index: 8, kind: output, shape index: {}]  }
   0x1   :  { %s3031_s29 = smov 0  }
   0x2 LB: > { %s37_s30 = sadd.s32 1, %s2961_s28  ;;  %p2737_p0 = scmp.ge.s32.totalorder %s2965_s29, 1  ;;  %s2965_s29 = sphi %s3031_s29, %s18_s29   ;;  %s2961_s28 = sphi %s3029_s28, %s3618_s28   ;;  %s2957_s27 = sphi %s3027_s27, %s3617_s27  }
   0x3   : > { %p39_p1 = scmp.ge.s32.totalorder %s37_s30, 2  ;;  %p305_p2 = scmp.lt.s32.totalorder %s2965_s29, 3 }
   0x5   : > { %s3620_s30 = smov (%p39_p1, %s37_s30), 0  ;;  %p306_p3 = pnand %p2737_p0, %p305_p2 }
   0x6   : > { %p355_p4 = scmp.lt.s32.totalorder (!%p306_p3), %s2957_s27, 1  ;;  %s2970_s19 = smov (!%p306_p3), 112  }
   0x7   : > { %309 = sbr.rel (%p306_p3) target bundleno = 925 (0x39d), region = 52  ;;  %s2971_s20 = smov (!%p306_p3), 120  }
   0x8   : > { %s2972_s21 = smov (!%p306_p3), 104   ;;  %s2973_s22 = smov (!%p306_p3), 96  }
   0x9   : > { %s2974_s23 = smov (!%p306_p3), 88   ;;  %s2975_s24 = smov (!%p306_p3), 80  }
   0xa   : > { %s2976_s9 = smov (!%p306_p3), 72   ;;  %s2978_s25 = smov (!%p306_p3), 16  }
   0xb   : > { %s2979_s26 = smov (!%p306_p3), 32   ;;  %s2981_s10 = smov (!%p306_p3), 64  }
   0xc   : > { %v2967_v0 = vmov 0.0   ;;  %vm2968_vm0 = vmmov 0   ;;  %v387_v1 = vld [vmem:[%s3613_s5] sm:$0xff]  ;;  %s3622_s27 = smov (!%p355_p4, %s2957_s27), 1  ;;  %v2969_v2 = vmov 0   ;;  %vm393_vm1 = vcmask 64512  }
   0xd   : > { %2817 = vmatprep.subr.mxu0 %v2967_v0  ;;  %2819 = vmatprep.mubr.msk.f32.mxu0 %vm2968_vm0, %v2967_v0  ;;  %s2773_s11 = sshll.u32 %s3622_s27, 3  ;;  %v385_v3 = vld [vmem:[%s3612_s4] sm:$0xff]  ;;  %vm1610_vm2 = vcmask 1043456   ;;  %vm1606_vm3 = vcmask 31744   ;;  %v2977_v22 = vmov 1966171168   ;;  %v547_v24 = vlaneseq }
   0xe   : > { %2941 = vset.pattern.permute.xlu0 %v2969_v2  ;;  %2822 = vmatprep.subr.mxu1 %v2967_v0  ;;  %s368_s14 = scalar_lea.vmem %s3609_s1, %s2773_s11  ;;  %v468_v5 = vld [vmem:[%s3614_s6] sm:$0xff]  ;;  %s362_s13 = scalar_lea.vmem %s3608_s0, %s2773_s11  ;;  %v545_v23 = vunpack.c.l.s4 %v2977_v22  ;;  %vm600_vm4 = vcmask 122880   ;;  %vm2319_vm5 = vcmask 1041409   ;;  %vm2322_vm6 = vcmask 1042434  }
   0xf   : > { %390 = vperm.xlu0 %2941, %v387_v1   ;;  %2824 = vmatprep.mubr.msk.f32.mxu1 %vm2968_vm0, %v2967_v0  ;;  %v386_v4 = vld [vmem:[%s368_s14] sm:$0xff]  ;;  %v548_v26 = vshrl.u32 %v547_v24, 7  ;;  %s2774_s17 = sshll.u32 %s3622_s27, 5  ;;  %vm2325_vm7 = vcmask 1043459   ;;  %vm2328_vm8 = vcmask 1044484   ;;  %vm2331_vm9 = vcmask 1045509  }
  0x10   : > { %2818 = vmatpush3.msra.mxu0 %v386_v4  ;;  %2823 = vmatpush3.msra.mxu1 %v468_v5  ;;  %v1598_v11 = vld [vmem:[%s3611_s3] sm:$0xff]  ;;  %v546_v25 = vunpack.c.0.s8 %v545_v23  ;;  %vm2334_vm10 = vcmask 1046534   ;;  %vm2337_vm11 = vcmask 1047559   ;;  %vm2340_vm12 = vcmask 130048  }
  0x11   : > { %2820 = vmatmul.mubr.msk.f32.vlgmr.msra.gmra.mxu0 %vm393_vm1, %v385_v3  ;;  %2827 = vmatprep.subr.mxu0 %v2967_v0  ;;  %v1597_v14 = vld [vmem:[%s362_s13] sm:$0xff]  ;;  %vm2359_vm13 = vcmask 261248   ;;  %vm2378_vm14 = vcmask 392448   ;;  %vm2397_vm15 = vcmask 523648  }
  0x12   : > { %2829 = vmatprep.mubr.msk.f32.mxu0 %vm2968_vm0, %v2967_v0  ;;  %2828 = vmatpush3.msra.mxu0 %v468_v5  ;;  %v1605_v15 = vcombine.high %v1597_v14, %v1597_v14  ;;  %v1596_v20 = vld [vmem:[%s3610_s2] sm:$0xff]  ;;  %v3113_v27 = vsub.s32 %v546_v25, %v548_v26 }
  0x13   : > { %2832 = vmatprep.subr.mxu1 %v2967_v0  ;;  %2837 = vmatprep.subr.mxu0 %v2967_v0  ;;  %v3132_v43 = vld [vmem:[%s3615_s7] sm:$0xff] }
  0x8a   : > { %v391_v6 = vpop.permute.xlu0 %390 }
  0xd1   : > { %v463_v7 = vpop.f32.mrf.mxu0 }
  0xd2   : > { %v464_v8 = vadd.f32 %v463_v7, %v391_v6 }
  0xd3   : > { %v2821_v9 = vpop.f32.mrf.mxu0 }
  0xd4   : > { %v467_v10 = vmax.f32 %v464_v8, 0.0 }
  0xd6   : > { %751 = vrot.lane.b32.xlu1 %v467_v10, %s2970_s19  ;;  %610 = vrot.lane.b32.xlu0 %v467_v10, %s2971_s20  ;;  %s3224_s20 = scalar_lea.vmem %s3616_s8, %s2774_s17 }
  0xd7   : > { %2825 = vmatmul.mubr.msk.f32.vlgmr.msra.gmra.mxu1 %vm393_vm1, %v467_v10 }
  0xd8   : > { %2833 = vmatpush3.msra.mxu1 %v468_v5  ;;  %2834 = vmatprep.mubr.msk.f32.mxu1 %vm2968_vm0, %v2967_v0 }
  0xd9   : > { %2842 = vmatprep.subr.mxu1 %v2967_v0 }
  0xda   : > { %892 = vrot.lane.b32.xlu1 %v467_v10, %s2972_s21  ;;  %1033 = vrot.lane.b32.xlu0 %v467_v10, %s2973_s22 }
  0xde   : > { %1174 = vrot.lane.b32.xlu1 %v467_v10, %s2974_s23  ;;  %1315 = vrot.lane.b32.xlu0 %v467_v10, %s2975_s24 }
  0xe2   : > { %1456 = vrot.lane.b32.xlu1 %v467_v10, %s2976_s9  ;;  %1601 = vperm.xlu0 %2941, %v1598_v11   ;;  %s2980_s9 = smov 48  }
 0x148   : > { %v752_v12 = vpop.permute.xlu1 %751  ;;  %v611_v13 = vpop.permute.xlu0 %610 }
 0x149   : > { %2830 = vmatmul.mubr.msk.f32.vlgmr.msra.gmra.mxu0 %vm393_vm1, %v611_v13  ;;  %2835 = vmatmul.mubr.msk.f32.vlgmr.msra.gmra.mxu1 %vm393_vm1, %v752_v12 }
 0x14a   : > { %2838 = vmatpush3.msra.mxu0 %v468_v5  ;;  %2839 = vmatprep.mubr.msk.f32.mxu0 %vm2968_vm0, %v2967_v0 }
 0x14b   : > { %2843 = vmatpush3.msra.mxu1 %v468_v5  ;;  %2844 = vmatprep.mubr.msk.f32.mxu1 %vm2968_vm0, %v2967_v0 }
 0x14c   : > { %v893_v16 = vpop.permute.xlu1 %892  ;;  %v1034_v17 = vpop.permute.xlu0 %1033  ;;  %2847 = vmatprep.subr.mxu0 %v2967_v0  ;;  %2852 = vmatprep.subr.mxu1 %v2967_v0 }
 0x14d   : > { %2840 = vmatmul.mubr.msk.f32.vlgmr.msra.gmra.mxu0 %vm393_vm1, %v893_v16  ;;  %2845 = vmatmul.mubr.msk.f32.vlgmr.msra.gmra.mxu1 %vm393_vm1, %v1034_v17 }
 0x14e   : > { %2848 = vmatpush3.msra.mxu0 %v468_v5  ;;  %2849 = vmatprep.mubr.msk.f32.mxu0 %vm2968_vm0, %v2967_v0 }
 0x14f   : > { %2853 = vmatpush3.msra.mxu1 %v468_v5  ;;  %2854 = vmatprep.mubr.msk.f32.mxu1 %vm2968_vm0, %v2967_v0 }
 0x150   : > { %v1175_v18 = vpop.permute.xlu1 %1174  ;;  %v1316_v19 = vpop.permute.xlu0 %1315  ;;  %2857 = vmatprep.subr.mxu0 %v2967_v0  ;;  %2752 = vmatprep.subr.msk.mxu1 %vm1610_vm2, %v1605_v15 }
 0x151   : > { %2850 = vmatmul.mubr.msk.f32.vlgmr.msra.gmra.mxu0 %vm393_vm1, %v1175_v18  ;;  %2855 = vmatmul.mubr.msk.f32.vlgmr.msra.gmra.mxu1 %vm393_vm1, %v1316_v19 }
 0x152   : > { %2858 = vmatpush3.msra.mxu0 %v468_v5  ;;  %2859 = vmatprep.mubr.msk.f32.mxu0 %vm2968_vm0, %v2967_v0  ;;  %vm2416_vm0 = vcmask 654848  }
 0x153   : > { %2753 = vmatpush1.msk.msra.mxu1 %vm1610_vm2, %v1597_v14  ;;  %1679 = vmatprep.mubr.f32.mxu1 %v2967_v0  ;;  %vm2454_vm2 = vcmask 917248  }
 0x154   : > { %v1457_v21 = vpop.permute.xlu1 %1456 }
 0x155   : > { %2860 = vmatmul.mubr.msk.f32.vlgmr.msra.gmra.mxu0 %vm393_vm1, %v1457_v21  ;;  %2754 = vmatmul.mubr.msk.f32.vlgmr.msra.gmra.mxu1 %vm1606_vm3, %v1596_v20  ;;  %vm2473_vm3 = vcmask 1048448  }
 0x156   : > { %2864 = vmatprep.mubr.msk.f32.mxu0 %vm393_vm1, %v3132_v43  ;;  %2869 = vmatprep.mubr.msk.f32.mxu1 %vm393_vm1, %v3132_v43 }
 0x197   : > { %v538_v28 = vpop.f32.mrf.mxu1 }
 0x198   : > { %v543_v29 = vcombine.high %v538_v28, %v538_v28  ;;  %v550_v30 = vrot.slane %v538_v28, %v3113_v27 }
 0x199   : > { %v2826_v31 = vpop.f32.mrf.mxu1 }
 0x19a   : > { %v557_v32 = vrot.slane %v543_v29, %v3113_v27  ;;  %v558_v33 = vcombine.high %v550_v30, %v550_v30  ;;  %v566_v34 = vrot.slane %v550_v30, %v3113_v27 }
 0x19c   : > { %v559_v35 = vcombine.high %v557_v32, %v557_v32  ;;  %v573_v36 = vrot.slane %v557_v32, %v3113_v27  ;;  %v580_v37 = vrot.slane %v558_v33, %v3113_v27  ;;  %v588_v38 = vcombine.high %v566_v34, %v566_v34  ;;  %601 = vst.msk [vmem:[#allocation2] sm:$0x1] %vm600_vm4, %v566_v34 }
 0x19e   : > { %v587_v39 = vrot.slane %v559_v35, %v3113_v27  ;;  %v589_v40 = vcombine.high %v573_v36, %v573_v36  ;;  %v590_v41 = vcombine.high %v580_v37, %v580_v37  ;;  %602 = vst.msk [vmem:[#allocation2 + $0x8] sm:$0x1] %vm600_vm4, %v580_v37  ;;  %603 = vst.msk [vmem:[#allocation2 + $0x10] sm:$0x1] %vm600_vm4, %v588_v38 }
 0x19f   : > { %605 = vst.msk [vmem:[#allocation2 + $0x20] sm:$0x1] %vm600_vm4, %v573_v36 }
 0x1a0   : > { %v591_v42 = vcombine.high %v587_v39, %v587_v39  ;;  %604 = vst.msk [vmem:[#allocation2 + $0x18] sm:$0x1] %vm600_vm4, %v590_v41  ;;  %606 = vst.msk [vmem:[#allocation2 + $0x28] sm:$0x1] %vm600_vm4, %v587_v39 }
 0x1a1   : > { %607 = vst.msk [vmem:[#allocation2 + $0x30] sm:$0x1] %vm600_vm4, %v589_v40 }
 0x1a2   : > { %608 = vst.msk [vmem:[#allocation2 + $0x38] sm:$0x1] %vm600_vm4, %v591_v42 }
 0x209   : > { %v680_v44 = vpop.f32.mrf.mxu0  ;;  %v821_v45 = vpop.f32.mrf.mxu1 }
 0x20a   : > { %v685_v46 = vcombine.high %v680_v44, %v680_v44  ;;  %v692_v47 = vrot.slane %v680_v44, %v3113_v27  ;;  %v826_v48 = vcombine.high %v821_v45, %v821_v45  ;;  %v833_v49 = vrot.slane %v821_v45, %v3113_v27 }
 0x20b   : > { %v2831_v50 = vpop.f32.mrf.mxu0  ;;  %v2836_v51 = vpop.f32.mrf.mxu1 }
 0x20c   : > { %v699_v52 = vrot.slane %v685_v46, %v3113_v27  ;;  %v700_v53 = vcombine.high %v692_v47, %v692_v47  ;;  %v708_v54 = vrot.slane %v692_v47, %v3113_v27  ;;  %v840_v55 = vrot.slane %v826_v48, %v3113_v27 }
 0x20d   : > { %v841_v56 = vcombine.high %v833_v49, %v833_v49  ;;  %v849_v57 = vrot.slane %v833_v49, %v3113_v27  ;;  %v962_v58 = vpop.f32.mrf.mxu0  ;;  %v1103_v59 = vpop.f32.mrf.mxu1 }
 0x20e   : > { %v701_v60 = vcombine.high %v699_v52, %v699_v52  ;;  %v715_v61 = vrot.slane %v699_v52, %v3113_v27  ;;  %v722_v62 = vrot.slane %v700_v53, %v3113_v27  ;;  %v730_v63 = vcombine.high %v708_v54, %v708_v54  ;;  %742 = vst.msk [vmem:[#allocation2 + $0x1] sm:$0x1] %vm600_vm4, %v708_v54 }
 0x20f   : > { %v842_v0 = vcombine.high %v840_v55, %v840_v55  ;;  %v856_v1 = vrot.slane %v840_v55, %v3113_v27  ;;  %v863_v2 = vrot.slane %v841_v56, %v3113_v27  ;;  %v871_v3 = vcombine.high %v849_v57, %v849_v57  ;;  %883 = vst.msk [vmem:[#allocation2 + $0x2] sm:$0x1] %vm600_vm4, %v849_v57  ;;  %v2841_v4 = vpop.f32.mrf.mxu0  ;;  %v2846_v5 = vpop.f32.mrf.mxu1 }
 0x210   : > { %v729_v6 = vrot.slane %v701_v60, %v3113_v27  ;;  %v731_v7 = vcombine.high %v715_v61, %v715_v61  ;;  %v732_v8 = vcombine.high %v722_v62, %v722_v62  ;;  %743 = vst.msk [vmem:[#allocation2 + $0x9] sm:$0x1] %vm600_vm4, %v722_v62  ;;  %744 = vst.msk [vmem:[#allocation2 + $0x11] sm:$0x1] %vm600_vm4, %v730_v63  ;;  %v1602_v63 = vpop.permute.xlu0 %1601 }
 0x211   : > { %746 = vst.msk [vmem:[#allocation2 + $0x21] sm:$0x1] %vm600_vm4, %v715_v61  ;;  %v967_v9 = vcombine.high %v962_v58, %v962_v58  ;;  %v870_v10 = vrot.slane %v842_v0, %v3113_v27  ;;  %v872_v11 = vcombine.high %v856_v1, %v856_v1  ;;  %v873_v12 = vcombine.high %v863_v2, %v863_v2  ;;  %v1244_v14 = vpop.f32.mrf.mxu0  ;;  %v3159_v15 = vpop.f32.mrf.mxu1 }
 0x212   : > { %884 = vst.msk [vmem:[#allocation2 + $0xa] sm:$0x1] %vm600_vm4, %v863_v2  ;;  %885 = vst.msk [vmem:[#allocation2 + $0x12] sm:$0x1] %vm600_vm4, %v871_v3  ;;  %v974_v13 = vrot.slane %v962_v58, %v3113_v27  ;;  %v733_v16 = vcombine.high %v729_v6, %v729_v6  ;;  %v1108_v18 = vcombine.high %v1103_v59, %v1103_v59 }
 0x213   : > { %887 = vst.msk [vmem:[#allocation2 + $0x22] sm:$0x1] %vm600_vm4, %v856_v1  ;;  %745 = vst.msk [vmem:[#allocation2 + $0x19] sm:$0x1] %vm600_vm4, %v732_v8  ;;  %v981_v17 = vrot.slane %v967_v9, %v3113_v27  ;;  %v1115_v19 = vrot.slane %v1103_v59, %v3113_v27  ;;  %v874_v20 = vcombine.high %v870_v10, %v870_v10  ;;  %v2851_v24 = vpop.f32.mrf.mxu0  ;;  %v2856_v25 = vpop.f32.mrf.mxu1 }
 0x214   : > { %747 = vst.msk [vmem:[#allocation2 + $0x29] sm:$0x1] %vm600_vm4, %v729_v6  ;;  %748 = vst.msk [vmem:[#allocation2 + $0x31] sm:$0x1] %vm600_vm4, %v731_v7  ;;  %v982_v21 = vcombine.high %v974_v13, %v974_v13  ;;  %v990_v22 = vrot.slane %v974_v13, %v3113_v27  ;;  %v1249_v23 = vcombine.high %v1244_v14, %v1244_v14 }
 0x215   : > { %886 = vst.msk [vmem:[#allocation2 + $0x1a] sm:$0x1] %vm600_vm4, %v873_v12  ;;  %888 = vst.msk [vmem:[#allocation2 + $0x2a] sm:$0x1] %vm600_vm4, %v870_v10  ;;  %v983_v26 = vcombine.high %v981_v17, %v981_v17  ;;  %v997_v28 = vrot.slane %v981_v17, %v3113_v27  ;;  %v1122_v29 = vrot.slane %v1108_v18, %v3113_v27  ;;  %v1526_v35 = vpop.f32.mrf.mxu0  ;;  %v1681_v58 = vpop.f32.mrf.mxu1 }
 0x216   : > { %889 = vst.msk [vmem:[#allocation2 + $0x32] sm:$0x1] %vm600_vm4, %v872_v11  ;;  %749 = vst.msk [vmem:[#allocation2 + $0x39] sm:$0x1] %vm600_vm4, %v733_v16  ;;  %v1123_v30 = vcombine.high %v1115_v19, %v1115_v19  ;;  %v1004_v31 = vrot.slane %v982_v21, %v3113_v27  ;;  %v1012_v32 = vcombine.high %v990_v22, %v990_v22 }
 0x217   : > { %890 = vst.msk [vmem:[#allocation2 + $0x3a] sm:$0x1] %vm600_vm4, %v874_v20  ;;  %1024 = vst.msk [vmem:[#allocation2 + $0x3] sm:$0x1] %vm600_vm4, %v990_v22  ;;  %v1131_v33 = vrot.slane %v1115_v19, %v3113_v27  ;;  %v1256_v34 = vrot.slane %v1244_v14, %v3113_v27  ;;  %v1011_v36 = vrot.slane %v983_v26, %v3113_v27  ;;  %v2861_v45 = vpop.f32.mrf.mxu0  ;;  %v1683_v16 = vpop.f32.mrf.mxu1 }
 0x218   : > { %v1013_v37 = vcombine.high %v997_v28, %v997_v28  ;;  %1028 = vst.msk [vmem:[#allocation2 + $0x23] sm:$0x1] %vm600_vm4, %v997_v28  ;;  %v1124_v38 = vcombine.high %v1122_v29, %v1122_v29  ;;  %v1138_v39 = vrot.slane %v1122_v29, %v3113_v27  ;;  %v1014_v40 = vcombine.high %v1004_v31, %v1004_v31 }
 0x219   : > { %1025 = vst.msk [vmem:[#allocation2 + $0xb] sm:$0x1] %vm600_vm4, %v1004_v31  ;;  %1026 = vst.msk [vmem:[#allocation2 + $0x13] sm:$0x1] %vm600_vm4, %v1012_v32  ;;  %v1145_v41 = vrot.slane %v1123_v30, %v3113_v27  ;;  %v1153_v42 = vcombine.high %v1131_v33, %v1131_v33  ;;  %v1263_v44 = vrot.slane %v1249_v23, %v3113_v27  ;;  %v1694_v31 = vld [vmem:[%s3615_s7 + $0x8] sm:$0xff] }
 0x21a   : > { %1165 = vst.msk [vmem:[#allocation2 + $0x4] sm:$0x1] %vm600_vm4, %v1131_v33  ;;  %v1015_v46 = vcombine.high %v1011_v36, %v1011_v36  ;;  %1029 = vst.msk [vmem:[#allocation2 + $0x2b] sm:$0x1] %vm600_vm4, %v1011_v36  ;;  %v1152_v47 = vrot.slane %v1124_v38, %v3113_v27  ;;  %v1154_v48 = vcombine.high %v1138_v39, %v1138_v39 }
 0x21b   : > { %1030 = vst.msk [vmem:[#allocation2 + $0x33] sm:$0x1] %vm600_vm4, %v1013_v37  ;;  %1169 = vst.msk [vmem:[#allocation2 + $0x24] sm:$0x1] %vm600_vm4, %v1138_v39  ;;  %v1264_v49 = vcombine.high %v1256_v34, %v1256_v34  ;;  %v1155_v50 = vcombine.high %v1145_v41, %v1145_v41  ;;  %v1265_v51 = vcombine.high %v1263_v44, %v1263_v44 }
 0x21c   : > { %1027 = vst.msk [vmem:[#allocation2 + $0x1b] sm:$0x1] %vm600_vm4, %v1014_v40  ;;  %1166 = vst.msk [vmem:[#allocation2 + $0xc] sm:$0x1] %vm600_vm4, %v1145_v41  ;;  %v1272_v52 = vrot.slane %v1256_v34, %v3113_v27  ;;  %v1279_v53 = vrot.slane %v1263_v44, %v3113_v27  ;;  %v1156_v54 = vcombine.high %v1152_v47, %v1152_v47 }
 0x21d   : > { %1167 = vst.msk [vmem:[#allocation2 + $0x14] sm:$0x1] %vm600_vm4, %v1153_v42  ;;  %1031 = vst.msk [vmem:[#allocation2 + $0x3b] sm:$0x1] %vm600_vm4, %v1015_v46  ;;  %v1286_v55 = vrot.slane %v1264_v49, %v3113_v27  ;;  %v1390_v56 = vcombine.high %v3159_v15, %v3159_v15  ;;  %v1397_v57 = vrot.slane %v3159_v15, %v3113_v27 }
 0x21e   : > { %1170 = vst.msk [vmem:[#allocation2 + $0x2c] sm:$0x1] %vm600_vm4, %v1152_v47  ;;  %1171 = vst.msk [vmem:[#allocation2 + $0x34] sm:$0x1] %vm600_vm4, %v1154_v48  ;;  %v1293_v59 = vrot.slane %v1265_v51, %v3113_v27  ;;  %v1294_v60 = vcombine.high %v1272_v52, %v1272_v52  ;;  %v1295_v61 = vcombine.high %v1279_v53, %v1279_v53 }
 0x21f   : > { %1168 = vst.msk [vmem:[#allocation2 + $0x1c] sm:$0x1] %vm600_vm4, %v1155_v50  ;;  %1306 = vst.msk [vmem:[#allocation2 + $0x5] sm:$0x1] %vm600_vm4, %v1272_v52  ;;  %v1531_v62 = vcombine.high %v1526_v35, %v1526_v35  ;;  %v1296_v0 = vcombine.high %v1286_v55, %v1286_v55  ;;  %v1404_v1 = vrot.slane %v1390_v56, %v3113_v27 }
 0x220   : > { %1310 = vst.msk [vmem:[#allocation2 + $0x25] sm:$0x1] %vm600_vm4, %v1279_v53  ;;  %1172 = vst.msk [vmem:[#allocation2 + $0x3c] sm:$0x1] %vm600_vm4, %v1156_v54  ;;  %v1405_v2 = vcombine.high %v1397_v57, %v1397_v57  ;;  %v1413_v3 = vrot.slane %v1397_v57, %v3113_v27  ;;  %v1297_v4 = vcombine.high %v1293_v59, %v1293_v59 }
 0x221   : > { %1307 = vst.msk [vmem:[#allocation2 + $0xd] sm:$0x1] %vm600_vm4, %v1286_v55  ;;  %1308 = vst.msk [vmem:[#allocation2 + $0x15] sm:$0x1] %vm600_vm4, %v1294_v60  ;;  %v1538_v5 = vrot.slane %v1526_v35, %v3113_v27  ;;  %v1545_v6 = vrot.slane %v1531_v62, %v3113_v27  ;;  %v1682_v7 = vadd.f32 %v1681_v58, %v1602_v63 }
 0x222   : > { %1311 = vst.msk [vmem:[#allocation2 + $0x2d] sm:$0x1] %vm600_vm4, %v1293_v59  ;;  %1312 = vst.msk [vmem:[#allocation2 + $0x35] sm:$0x1] %vm600_vm4, %v1295_v61  ;;  %v1406_v8 = vcombine.high %v1404_v1, %v1404_v1  ;;  %v1420_v9 = vrot.slane %v1404_v1, %v3113_v27  ;;  %v1427_v10 = vrot.slane %v1405_v2, %v3113_v27 }
 0x223   : > { %1309 = vst.msk [vmem:[#allocation2 + $0x1d] sm:$0x1] %vm600_vm4, %v1296_v0  ;;  %v1435_v11 = vcombine.high %v1413_v3, %v1413_v3  ;;  %1447 = vst.msk [vmem:[#allocation2 + $0x6] sm:$0x1] %vm600_vm4, %v1413_v3  ;;  %v1546_v12 = vcombine.high %v1538_v5, %v1538_v5  ;;  %v1547_v13 = vcombine.high %v1545_v6, %v1545_v6  ;;  %v1686_v20 = vmax.f32 %v1682_v7, 0.0 }
 0x224   : > { %1313 = vst.msk [vmem:[#allocation2 + $0x3d] sm:$0x1] %vm600_vm4, %v1297_v4  ;;  %v1554_v14 = vrot.slane %v1538_v5, %v3113_v27  ;;  %v1561_v15 = vrot.slane %v1545_v6, %v3113_v27  ;;  %v1434_v17 = vrot.slane %v1406_v8, %v3113_v27  ;;  %v1436_v18 = vcombine.high %v1420_v9, %v1420_v9 }
 0x225   : > { %v1437_v19 = vcombine.high %v1427_v10, %v1427_v10  ;;  %1448 = vst.msk [vmem:[#allocation2 + $0xe] sm:$0x1] %vm600_vm4, %v1427_v10  ;;  %1449 = vst.msk [vmem:[#allocation2 + $0x16] sm:$0x1] %vm600_vm4, %v1435_v11  ;;  %v1568_v21 = vrot.slane %v1546_v12, %v3113_v27  ;;  %v1575_v22 = vrot.slane %v1547_v13, %v3113_v27 }
 0x226   : > { %1451 = vst.msk [vmem:[#allocation2 + $0x26] sm:$0x1] %vm600_vm4, %v1420_v9  ;;  %v1576_v23 = vcombine.high %v1554_v14, %v1554_v14  ;;  %v1577_v24 = vcombine.high %v1561_v15, %v1561_v15  ;;  %1588 = vst.msk [vmem:[#allocation2 + $0x7] sm:$0x1] %vm600_vm4, %v1554_v14  ;;  %v1438_v25 = vcombine.high %v1434_v17, %v1434_v17 }
 0x227   : > { %1592 = vst.msk [vmem:[#allocation2 + $0x27] sm:$0x1] %vm600_vm4, %v1561_v15  ;;  %1450 = vst.msk [vmem:[#allocation2 + $0x1e] sm:$0x1] %vm600_vm4, %v1437_v19  ;;  %v1684_v26 = vadd.f32 %v1683_v16, %v1602_v63  ;;  %v1578_v28 = vcombine.high %v1568_v21, %v1568_v21  ;;  %v1579_v29 = vcombine.high %v1575_v22, %v1575_v22 }
 0x228   : > { %1452 = vst.msk [vmem:[#allocation2 + $0x2e] sm:$0x1] %vm600_vm4, %v1434_v17  ;;  %1453 = vst.msk [vmem:[#allocation2 + $0x36] sm:$0x1] %vm600_vm4, %v1436_v18 }
 0x229   : > { %1688 = vst [vmem:[%s3224_s20] sm:$0xff] %v1686_v20  ;;  %1589 = vst.msk [vmem:[#allocation2 + $0xf] sm:$0x1] %vm600_vm4, %v1568_v21  ;;  %v1687_v27 = vmax.f32 %v1684_v26, 0.0 }
 0x22a   : > { %1590 = vst.msk [vmem:[#allocation2 + $0x17] sm:$0x1] %vm600_vm4, %v1576_v23  ;;  %1593 = vst.msk [vmem:[#allocation2 + $0x2f] sm:$0x1] %vm600_vm4, %v1575_v22 }
 0x22b   : > { %1594 = vst.msk [vmem:[#allocation2 + $0x37] sm:$0x1] %vm600_vm4, %v1577_v24  ;;  %1454 = vst.msk [vmem:[#allocation2 + $0x3e] sm:$0x1] %vm600_vm4, %v1438_v25 }
 0x22c   : > { %1591 = vst.msk [vmem:[#allocation2 + $0x1f] sm:$0x1] %vm600_vm4, %v1578_v28  ;;  %1595 = vst.msk [vmem:[#allocation2 + $0x3f] sm:$0x1] %vm600_vm4, %v1579_v29 }
 0x22d   : > { %1689 = vst [vmem:[%s3224_s20 + $0x8] sm:$0xff] %v1687_v27  ;;  %v1695_v30 = vld [vmem:[#allocation2] sm:$0xff] }
 0x22e   : > { %2862 = vmatprep.subr.mxu0 %v1695_v30  ;;  %v1699_v35 = vld [vmem:[#allocation2 + $0x20] sm:$0xff] }
 0x22f   : > { %2863 = vmatpush3.msra.mxu0 %v1695_v30 }
 0x230   : > { %v1696_v32 = vld [vmem:[#allocation2 + $0x8] sm:$0xff]  ;;  %2865 = vmatmul.mubr.msk.f32.vlgmr.msra.gmra.mxu0 %vm393_vm1, %v1694_v31 }
 0x231   : > { %v1697_v33 = vld [vmem:[#allocation2 + $0x10] sm:$0xff]  ;;  %2867 = vmatprep.subr.mxu1 %v1696_v32  ;;  %2874 = vmatprep.mubr.msk.f32.mxu0 %vm393_vm1, %v3132_v43  ;;  %v1700_v36 = vld [vmem:[#allocation2 + $0x28] sm:$0xff] }
 0x232   : > { %2872 = vmatprep.subr.mxu0 %v1697_v33  ;;  %2868 = vmatpush3.msra.mxu1 %v1696_v32  ;;  %v1701_v37 = vld [vmem:[#allocation2 + $0x30] sm:$0xff] }
 0x233   : > { %v1698_v34 = vld [vmem:[#allocation2 + $0x18] sm:$0xff]  ;;  %2873 = vmatpush3.msra.mxu0 %v1697_v33  ;;  %2870 = vmatmul.mubr.msk.f32.vlgmr.msra.gmra.mxu1 %vm393_vm1, %v1694_v31 }
 0x234   : > { %2877 = vmatprep.subr.mxu1 %v1698_v34  ;;  %2882 = vmatprep.subr.mxu0 %v1699_v35  ;;  %v1702_v38 = vld [vmem:[#allocation2 + $0x38] sm:$0xff] }
 0x235   : > { %2878 = vmatpush3.msra.mxu1 %v1698_v34  ;;  %2875 = vmatmul.mubr.msk.f32.vlgmr.msra.gmra.mxu0 %vm393_vm1, %v1694_v31 }
 0x236   : > { %2887 = vmatprep.subr.mxu1 %v1700_v36  ;;  %2883 = vmatpush3.msra.mxu0 %v1699_v35 }
 0x237   : > { %2879 = vmatprep.mubr.msk.f32.mxu1 %vm393_vm1, %v3132_v43  ;;  %2892 = vmatprep.subr.mxu0 %v1701_v37 }
 0x238   : > { %2880 = vmatmul.mubr.msk.f32.vlgmr.msra.gmra.mxu1 %vm393_vm1, %v1694_v31  ;;  %2884 = vmatprep.mubr.msk.f32.mxu0 %vm393_vm1, %v3132_v43 }
 0x239   : > { %2888 = vmatpush3.msra.mxu1 %v1700_v36  ;;  %2885 = vmatmul.mubr.msk.f32.vlgmr.msra.gmra.mxu0 %vm393_vm1, %v1694_v31 }
 0x23a   : > { %2897 = vmatprep.subr.mxu1 %v1702_v38  ;;  %2893 = vmatpush3.msra.mxu0 %v1701_v37 }
 0x23b   : > { %2889 = vmatprep.mubr.msk.f32.mxu1 %vm393_vm1, %v3132_v43  ;;  %2894 = vmatprep.mubr.msk.f32.mxu0 %vm393_vm1, %v3132_v43 }
 0x23c   : > { %2890 = vmatmul.mubr.msk.f32.vlgmr.msra.gmra.mxu1 %vm393_vm1, %v1694_v31 }
 0x23d   : > { %2898 = vmatpush3.msra.mxu1 %v1702_v38  ;;  %2899 = vmatprep.mubr.msk.f32.mxu1 %vm393_vm1, %v3132_v43 }
 0x23e   : > { %2895 = vmatmul.mubr.msk.f32.vlgmr.msra.gmra.mxu0 %vm393_vm1, %v1694_v31 }
 0x240   : > { %2900 = vmatmul.mubr.msk.f32.vlgmr.msra.gmra.mxu1 %vm393_vm1, %v1694_v31  ;;  %vm2435_vm1 = vcmask 786048  }
 0x2f0   : > { %v3272_v39 = vpop.f32.mrf.mxu0 }
 0x2f1   : > { %v2499_v40 = vrot.slane %v3272_v39, 1  ;;  %v2517_v41 = vrot.slane %v3272_v39, 2  ;;  %v2535_v42 = vrot.slane %v3272_v39, 3  ;;  %v2553_v43 = vrot.slane %v3272_v39, 4 }
 0x2f2   : > { %v3277_v44 = vpop.f32.mrf.mxu0  ;;  %v2571_v46 = vrot.slane %v3272_v39, 5  ;;  %v2589_v47 = vrot.slane %v3272_v39, 6  ;;  %v2607_v48 = vrot.slane %v3272_v39, 7 }
 0x2f3   : > { %v3279_v45 = vpop.f32.mrf.mxu1  ;;  %v2342_v51 = vrot.slane %v3277_v44, 1  ;;  %v2361_v54 = vrot.slane %v3277_v44, 2  ;;  %v2380_v56 = vrot.slane %v3277_v44, 3 }
 0x2f4   : > { %v2483_v49 = vrot.slane %v3279_v45, 7  ;;  %v2500_v50 = vsel %vm2319_vm5, %v3279_v45, %v2499_v40  ;;  %v2518_v52 = vrot.slane %v3279_v45, 1  ;;  %v2536_v55 = vrot.slane %v3279_v45, 2 }
 0x2f5   : > { %v3290_v53 = vpop.f32.mrf.mxu1  ;;  %v2554_v57 = vrot.slane %v3279_v45, 3  ;;  %v3297_v59 = vpop.f32.mrf.mxu0 }
 0x2f6   : > { %v2318_v58 = vrot.slane %v3290_v53, 7  ;;  %v2343_v60 = vsel %vm2319_vm5, %v3290_v53, %v2342_v51  ;;  %v2519_v61 = vsel %vm2319_vm5, %v2518_v52, %v2517_v41  ;;  %v2362_v62 = vrot.slane %v3290_v53, 1 }
 0x2f7   : > { %v2485_v63 = vrot.slane %v3297_v59, 6  ;;  %v2501_v0 = vrot.slane %v3297_v59, 7  ;;  %v2520_v1 = vsel %vm2322_vm6, %v3297_v59, %v2519_v61  ;;  %v2537_v2 = vsel %vm2319_vm5, %v2536_v55, %v2535_v42  ;;  %v3308_v3 = vpop.f32.mrf.mxu0 }
 0x2f8   : > { %v3310_v4 = vpop.f32.mrf.mxu1  ;;  %v2363_v5 = vsel %vm2319_vm5, %v2362_v62, %v2361_v54  ;;  %v2538_v6 = vrot.slane %v3297_v59, 1  ;;  %v2381_v7 = vrot.slane %v3290_v53, 2  ;;  %v3316_v8 = vsel %vm2319_vm5, %v2554_v57, %v2553_v43 }
 0x2f9   : > { %v2321_v9 = vrot.slane %v3308_v3, 6  ;;  %v2487_v10 = vrot.slane %v3310_v4, 5  ;;  %v2502_v11 = vsel %vm2322_vm6, %v2501_v0, %v2500_v50  ;;  %v2503_v12 = vrot.slane %v3310_v4, 6  ;;  %v3324_v14 = vpop.f32.mrf.mxu0 }
 0x2fa   : > { %v3322_v13 = vpop.f32.mrf.mxu1  ;;  %v2344_v15 = vrot.slane %v3308_v3, 7  ;;  %v2521_v16 = vrot.slane %v3310_v4, 7  ;;  %v2364_v17 = vsel %vm2322_vm6, %v3308_v3, %v2363_v5  ;;  %v2539_v18 = vsel %vm2322_vm6, %v2538_v6, %v2537_v2 }
 0x2fb   : > { %v2324_v19 = vrot.slane %v3322_v13, 5  ;;  %v2489_v20 = vrot.slane %v3324_v14, 4  ;;  %v2504_v21 = vsel %vm2325_vm7, %v2503_v12, %v2502_v11  ;;  %v2505_v22 = vrot.slane %v3324_v14, 5  ;;  %v3335_v23 = vpop.f32.mrf.mxu0 }
 0x2fc   : > { %v3337_v24 = vpop.f32.mrf.mxu1  ;;  %v2345_v25 = vsel %vm2322_vm6, %v2344_v15, %v2343_v60  ;;  %v2346_v26 = vrot.slane %v3322_v13, 6  ;;  %v2522_v28 = vsel %vm2325_vm7, %v2521_v16, %v2520_v1  ;;  %v2523_v29 = vrot.slane %v3324_v14, 6 }
 0x2fd   : > { %v2327_v27 = vrot.slane %v3335_v23, 4  ;;  %v2506_v30 = vsel %vm2328_vm8, %v2505_v22, %v2504_v21  ;;  %v2507_v31 = vrot.slane %v3337_v24, 4  ;;  %v2348_v32 = vrot.slane %v3335_v23, 5 }
 0x2fe   : > { %v3347_v33 = vpop.f32.mrf.mxu1  ;;  %v3349_v34 = vpop.f32.mrf.mxu0  ;;  %v2347_v35 = vsel %vm2325_vm7, %v2346_v26, %v2345_v25  ;;  %v2524_v36 = vsel %vm2328_vm8, %v2523_v29, %v2522_v28  ;;  %v2525_v37 = vrot.slane %v3337_v24, 5  ;;  %v2365_v38 = vrot.slane %v3322_v13, 7 }
 0x2ff   : > { %v2508_v40 = vsel %vm2331_vm9, %v2507_v31, %v2506_v30  ;;  %v2509_v41 = vrot.slane %v3349_v34, 3  ;;  %v2349_v42 = vsel %vm2328_vm8, %v2348_v32, %v2347_v35  ;;  %v2350_v43 = vrot.slane %v3347_v33, 4 }
 0x300   : > { %v3359_v50 = vpop.f32.mrf.mxu0  ;;  %v3361_v51 = vpop.f32.mrf.mxu1  ;;  %v2526_v52 = vsel %vm2331_vm9, %v2525_v37, %v2524_v36  ;;  %v2527_v54 = vrot.slane %v3349_v34, 4  ;;  %v2366_v55 = vsel %vm2325_vm7, %v2365_v38, %v2364_v17  ;;  %v2367_v57 = vrot.slane %v3335_v23, 6 }
 0x301   : > { %v2333_v60 = vrot.slane %v3359_v50, 2  ;;  %v2510_v61 = vsel %vm2334_vm10, %v2509_v41, %v2508_v40  ;;  %v2511_v62 = vrot.slane %v3361_v51, 2  ;;  %v2351_v0 = vsel %vm2331_vm9, %v2350_v43, %v2349_v42 }
 0x302   : > { %v3371_v1 = vpop.f32.mrf.mxu1  ;;  %v2352_v2 = vrot.slane %v3359_v50, 3  ;;  %v2528_v5 = vsel %vm2334_vm10, %v2527_v54, %v2526_v52  ;;  %v2529_v6 = vrot.slane %v3361_v51, 3  ;;  %v2368_v11 = vsel %vm2328_vm8, %v2367_v57, %v2366_v55 }
 0x303   : > { %v2512_v12 = vsel %vm2337_vm11, %v2511_v62, %v2510_v61  ;;  %v2354_v15 = vrot.slane %v3371_v1, 2  ;;  %v2369_v16 = vrot.slane %v3347_v33, 5  ;;  %v2371_v17 = vrot.slane %v3359_v50, 4 }
 0x304   : > { %2513 = vrot.lane.b32.xlu0 %v2512_v12, %s2978_s25  ;;  %v2353_v21 = vsel %vm2334_vm10, %v2352_v2, %v2351_v0  ;;  %v2530_v22 = vsel %vm2337_vm11, %v2529_v6, %v2528_v5  ;;  %v2373_v25 = vrot.slane %v3371_v1, 3  ;;  %v2540_v26 = vsel %vm2325_vm7, %v3310_v4, %v2539_v18 }
 0x305   : > { %v2355_v28 = vsel %vm2337_vm11, %v2354_v15, %v2353_v21  ;;  %v2370_v29 = vsel %vm2331_vm9, %v2369_v16, %v2368_v11  ;;  %v2541_v30 = vrot.slane %v3324_v14, 7  ;;  %v2543_v31 = vrot.slane %v3337_v24, 6 }
 0x306   : > { %2356 = vrot.lane.b32.xlu1 %v2355_v28, %s2978_s25  ;;  %v2372_v32 = vsel %vm2334_vm10, %v2371_v17, %v2370_v29  ;;  %v2545_v35 = vrot.slane %v3349_v34, 5  ;;  %v2547_v36 = vrot.slane %v3361_v51, 4  ;;  %v2382_v18 = vsel %vm2319_vm5, %v2381_v7, %v2380_v56 }
 0x307   : > { %v2374_v37 = vsel %vm2337_vm11, %v2373_v25, %v2372_v32  ;;  %v2542_v38 = vsel %vm2328_vm8, %v2541_v30, %v2540_v26  ;;  %v2383_v40 = vrot.slane %v3308_v3, 1  ;;  %v2386_v41 = vrot.slane %v3335_v23, 7 }
 0x308   : > { %2531 = vrot.lane.b32.xlu0 %v2530_v22, %s2979_s26  ;;  %v2544_v42 = vsel %vm2331_vm9, %v2543_v31, %v2542_v38  ;;  %v2388_v43 = vrot.slane %v3347_v33, 6  ;;  %v2390_v52 = vrot.slane %v3359_v50, 5  ;;  %v2392_v54 = vrot.slane %v3371_v1, 4 }
 0x309   : > { %v2546_v56 = vsel %vm2334_vm10, %v2545_v35, %v2544_v42  ;;  %v2384_v7 = vsel %vm2322_vm6, %v2383_v40, %v2382_v18  ;;  %v2556_v55 = vrot.slane %v3297_v59, 2  ;;  %v2558_v57 = vrot.slane %v3310_v4, 1 }
 0x30a   : > { %2375 = vrot.lane.b32.xlu1 %v2374_v37, %s2979_s26  ;;  %v2548_v61 = vsel %vm2337_vm11, %v2547_v36, %v2546_v56  ;;  %v2385_v62 = vsel %vm2325_vm7, %v3322_v13, %v2384_v7  ;;  %v2561_v0 = vrot.slane %v3337_v24, 7  ;;  %v2563_v2 = vrot.slane %v3349_v34, 6 }
 0x30b   : > { %v2387_v5 = vsel %vm2328_vm8, %v2386_v41, %v2385_v62  ;;  %v2557_v6 = vsel %vm2322_vm6, %v2556_v55, %v3316_v8  ;;  %v2565_v11 = vrot.slane %v3361_v51, 5  ;;  %v2399_v12 = vrot.slane %v3277_v44, 4 }
 0x30c   : > { %2549 = vrot.lane.b32.xlu0 %v2548_v61, %s2980_s9  ;;  %v2389_v15 = vsel %vm2331_vm9, %v2388_v43, %v2387_v5  ;;  %v2559_v16 = vsel %vm2325_vm7, %v2558_v57, %v2557_v6  ;;  %v2400_v17 = vrot.slane %v3290_v53, 3  ;;  %v2402_v21 = vrot.slane %v3308_v3, 2 }
 0x30d   : > { %v2391_v22 = vsel %vm2334_vm10, %v2390_v52, %v2389_v15  ;;  %v2560_v25 = vsel %vm2328_vm8, %v3324_v14, %v2559_v16  ;;  %v2404_v8 = vrot.slane %v3322_v13, 1  ;;  %v2407_v26 = vrot.slane %v3347_v33, 7 }
 0x30e   : > { %v2393_v28 = vsel %vm2337_vm11, %v2392_v54, %v2391_v22  ;;  %v2562_v29 = vsel %vm2331_vm9, %v2561_v0, %v2560_v25  ;;  %v2401_v30 = vsel %vm2319_vm5, %v2400_v17, %v2399_v12  ;;  %v2409_v31 = vrot.slane %v3359_v50, 6 }
 0x30f   : > { %2394 = vrot.lane.b32.xlu1 %v2393_v28, %s2980_s9  ;;  %v2564_v32 = vsel %vm2334_vm10, %v2563_v2, %v2562_v29  ;;  %v2403_v35 = vsel %vm2322_vm6, %v2402_v21, %v2401_v30  ;;  %v2411_v36 = vrot.slane %v3371_v1, 5  ;;  %v2572_v18 = vrot.slane %v3279_v45, 4 }
 0x310   : > { %v2566_v37 = vsel %vm2337_vm11, %v2565_v11, %v2564_v32  ;;  %v2405_v38 = vsel %vm2325_vm7, %v2404_v8, %v2403_v35  ;;  %v2574_v40 = vrot.slane %v3297_v59, 3  ;;  %v2576_v41 = vrot.slane %v3310_v4, 2 }
 0x311   : > { %2567 = vrot.lane.b32.xlu0 %v2566_v37, %s2981_s10  ;;  %v2406_v42 = vsel %vm2328_vm8, %v3335_v23, %v2405_v38  ;;  %v2573_v43 = vsel %vm2319_vm5, %v2572_v18, %v2571_v46  ;;  %v2578_v52 = vrot.slane %v3324_v14, 1  ;;  %v2581_v54 = vrot.slane %v3349_v34, 7 }
 0x312   : > { %v2408_v56 = vsel %vm2331_vm9, %v2407_v26, %v2406_v42  ;;  %v2575_v7 = vsel %vm2322_vm6, %v2574_v40, %v2573_v43  ;;  %v2583_v55 = vrot.slane %v3361_v51, 6  ;;  %v2418_v57 = vrot.slane %v3277_v44, 5 }
 0x313   : > { %v2410_v61 = vsel %vm2334_vm10, %v2409_v31, %v2408_v56  ;;  %v2577_v62 = vsel %vm2325_vm7, %v2576_v41, %v2575_v7  ;;  %v2419_v0 = vrot.slane %v3290_v53, 4  ;;  %v2421_v46 = vrot.slane %v3308_v3, 3 }
 0x314   : > { %v2412_v2 = vsel %vm2337_vm11, %v2411_v36, %v2410_v61  ;;  %v2579_v5 = vsel %vm2328_vm8, %v2578_v52, %v2577_v62  ;;  %v2423_v6 = vrot.slane %v3322_v13, 2  ;;  %v2425_v11 = vrot.slane %v3335_v23, 1 }
 0x315   : > { %2413 = vrot.lane.b32.xlu1 %v2412_v2, %s2981_s10  ;;  %v2580_v12 = vsel %vm2331_vm9, %v3337_v24, %v2579_v5  ;;  %v2420_v15 = vsel %vm2319_vm5, %v2419_v0, %v2418_v57  ;;  %v2428_v16 = vrot.slane %v3359_v50, 7  ;;  %v2430_v17 = vrot.slane %v3371_v1, 6 }
 0x316   : > { %v2582_v21 = vsel %vm2334_vm10, %v2581_v54, %v2580_v12  ;;  %v2422_v22 = vsel %vm2322_vm6, %v2421_v46, %v2420_v15  ;;  %v2590_v25 = vrot.slane %v3279_v45, 5  ;;  %v2592_v8 = vrot.slane %v3297_v59, 4 }
 0x317   : > { %v2584_v26 = vsel %vm2337_vm11, %v2583_v55, %v2582_v21  ;;  %v2424_v28 = vsel %vm2325_vm7, %v2423_v6, %v2422_v22  ;;  %v2594_v29 = vrot.slane %v3310_v4, 3  ;;  %v2596_v30 = vrot.slane %v3324_v14, 2 }
 0x318   : > { %2585 = vrot.lane.b32.xlu0 %v2584_v26, %s2975_s24  ;;  %v2426_v31 = vsel %vm2328_vm8, %v2425_v11, %v2424_v28  ;;  %v2591_v32 = vsel %vm2319_vm5, %v2590_v25, %v2589_v47  ;;  %v2598_v35 = vrot.slane %v3337_v24, 1  ;;  %v2601_v36 = vrot.slane %v3361_v51, 7 }
 0x319   : > { %v2427_v18 = vsel %vm2331_vm9, %v3347_v33, %v2426_v31  ;;  %v2593_v37 = vsel %vm2322_vm6, %v2592_v8, %v2591_v32  ;;  %v2437_v38 = vrot.slane %v3277_v44, 6  ;;  %v2438_v40 = vrot.slane %v3290_v53, 5 }
 0x31a   : > { %v2429_v41 = vsel %vm2334_vm10, %v2428_v16, %v2427_v18  ;;  %v2595_v42 = vsel %vm2325_vm7, %v2594_v29, %v2593_v37  ;;  %v2440_v43 = vrot.slane %v3308_v3, 4  ;;  %v2442_v47 = vrot.slane %v3322_v13, 3 }
 0x31b   : > { %v2431_v52 = vsel %vm2337_vm11, %v2430_v17, %v2429_v41  ;;  %v2597_v54 = vsel %vm2328_vm8, %v2596_v30, %v2595_v42  ;;  %v2439_v56 = vsel %vm2319_vm5, %v2438_v40, %v2437_v38  ;;  %v2444_v7 = vrot.slane %v3335_v23, 2 }
 0x31c   : > { %2432 = vrot.lane.b32.xlu1 %v2431_v52, %s2975_s24  ;;  %v2599_v55 = vsel %vm2331_vm9, %v2598_v35, %v2597_v54  ;;  %v2441_v57 = vsel %vm2322_vm6, %v2440_v43, %v2439_v56  ;;  %v2446_v61 = vrot.slane %v3347_v33, 1  ;;  %v2449_v62 = vrot.slane %v3371_v1, 7 }
 0x31d   : > { %v2600_v0 = vsel %vm2334_vm10, %v3349_v34, %v2599_v55  ;;  %v2443_v46 = vsel %vm2325_vm7, %v2442_v47, %v2441_v57  ;;  %v2608_v2 = vrot.slane %v3279_v45, 6  ;;  %v2610_v5 = vrot.slane %v3297_v59, 5 }
 0x31e   : > { %v2602_v6 = vsel %vm2337_vm11, %v2601_v36, %v2600_v0  ;;  %v2445_v11 = vsel %vm2328_vm8, %v2444_v7, %v2443_v46  ;;  %v2612_v12 = vrot.slane %v3310_v4, 4  ;;  %v2614_v15 = vrot.slane %v3324_v14, 3 }
 0x31f   : > { %2603 = vrot.lane.b32.xlu0 %v2602_v6, %s2973_s22  ;;  %v2447_v16 = vsel %vm2331_vm9, %v2446_v61, %v2445_v11  ;;  %v2609_v17 = vsel %vm2319_vm5, %v2608_v2, %v2607_v48  ;;  %v2616_v21 = vrot.slane %v3337_v24, 2  ;;  %v2618_v22 = vrot.slane %v3349_v34, 1 }
 0x320   : > { %v2448_v25 = vsel %vm2334_vm10, %v3359_v50, %v2447_v16  ;;  %v2611_v8 = vsel %vm2322_vm6, %v2610_v5, %v2609_v17  ;;  %v2456_v26 = vrot.slane %v3277_v44, 7  ;;  %v2457_v28 = vrot.slane %v3290_v53, 6 }
 0x321   : > { %v2450_v29 = vsel %vm2337_vm11, %v2449_v62, %v2448_v25  ;;  %v2613_v30 = vsel %vm2325_vm7, %v2612_v12, %v2611_v8  ;;  %v2459_v48 = vrot.slane %v3308_v3, 5  ;;  %v2461_v31 = vrot.slane %v3322_v13, 4 }
 0x322   : > { %2451 = vrot.lane.b32.xlu1 %v2450_v29, %s2973_s22  ;;  %v2615_v32 = vsel %vm2328_vm8, %v2614_v15, %v2613_v30  ;;  %v2458_v35 = vsel %vm2319_vm5, %v2457_v28, %v2456_v26  ;;  %v2463_v36 = vrot.slane %v3335_v23, 3  ;;  %v2465_v18 = vrot.slane %v3347_v33, 2 }
 0x323   : > { %v2617_v37 = vsel %vm2331_vm9, %v2616_v21, %v2615_v32  ;;  %v2460_v38 = vsel %vm2322_vm6, %v2459_v48, %v2458_v35  ;;  %v2467_v40 = vrot.slane %v3359_v50, 1  ;;  %v2484_v41 = vsel %vm2319_vm5, %v2483_v49, %v3272_v39 }
 0x324   : > { %v2619_v42 = vsel %vm2334_vm10, %v2618_v22, %v2617_v37  ;;  %v2462_v43 = vsel %vm2325_vm7, %v2461_v31, %v2460_v38  ;;  %v2486_v47 = vsel %vm2322_vm6, %v2485_v63, %v2484_v41  ;;  %v2491_v52 = vrot.slane %v3337_v24, 3 }
 0x325   : > { %v2620_v54 = vsel %vm2337_vm11, %v3361_v51, %v2619_v42  ;;  %v2464_v56 = vsel %vm2328_vm8, %v2463_v36, %v2462_v43  ;;  %v2488_v45 = vsel %vm2325_vm7, %v2487_v10, %v2486_v47  ;;  %v2493_v39 = vrot.slane %v3349_v34, 2 }
 0x326   : > { %2621 = vrot.lane.b32.xlu0 %v2620_v54, %s2970_s19  ;;  %v2466_v49 = vsel %vm2331_vm9, %v2465_v18, %v2464_v56  ;;  %v2490_v59 = vsel %vm2328_vm8, %v2489_v20, %v2488_v45  ;;  %v2495_v63 = vrot.slane %v3361_v51, 1  ;;  %v2320_v4 = vsel %vm2319_vm5, %v2318_v58, %v3277_v44 }
 0x327   : > { %v2468_v10 = vsel %vm2334_vm10, %v2467_v40, %v2466_v49  ;;  %v2492_v24 = vsel %vm2331_vm9, %v2491_v52, %v2490_v59  ;;  %v2323_v34 = vsel %vm2322_vm6, %v2321_v9, %v2320_v4  ;;  %v2330_v14 = vrot.slane %v3347_v33, 3 }
 0x328   : > { %v2469_v20 = vsel %vm2337_vm11, %v3371_v1, %v2468_v10  ;;  %v2494_v51 = vsel %vm2334_vm10, %v2493_v39, %v2492_v24  ;;  %v2326_v44 = vsel %vm2325_vm7, %v2324_v19, %v2323_v34  ;;  %v2336_v53 = vrot.slane %v3371_v1, 1 }
 0x329   : > { %2470 = vrot.lane.b32.xlu1 %v2469_v20, %s2970_s19  ;;  %v2496_v58 = vsel %vm2337_vm11, %v2495_v63, %v2494_v51  ;;  %v2329_v3 = vsel %vm2328_vm8, %v2327_v27, %v2326_v44 }
 0x32a   : > { %2498 = vst.msk [vmem:[%s3224_s20 + $0x18] sm:$0xff] %vm2340_vm12, %v2496_v58  ;;  %v2332_v9 = vsel %vm2331_vm9, %v2330_v14, %v2329_v3 }
 0x32b   : > { %v2335_v13 = vsel %vm2334_vm10, %v2333_v60, %v2332_v9 }
 0x32c   : > { %v2338_v19 = vsel %vm2337_vm11, %v2336_v53, %v2335_v13 }
 0x32d   : > { %2341 = vst.msk [vmem:[%s3224_s20 + $0x10] sm:$0xff] %vm2340_vm12, %v2338_v19 }
 0x376   : > { %v2514_v33 = vpop.permute.xlu0 %2513 }
 0x377   : > { %2516 = vst.msk [vmem:[%s3224_s20 + $0x18] sm:$0xff] %vm2359_vm13, %v2514_v33 }
 0x378   : > { %v2357_v23 = vpop.permute.xlu1 %2356 }
 0x379   : > { %2360 = vst.msk [vmem:[%s3224_s20 + $0x10] sm:$0xff] %vm2359_vm13, %v2357_v23 }
 0x37a   : > { %v2532_v27 = vpop.permute.xlu0 %2531 }
 0x37b   : > { %2534 = vst.msk [vmem:[%s3224_s20 + $0x18] sm:$0xff] %vm2378_vm14, %v2532_v27 }
 0x37c   : > { %v2376_v50 = vpop.permute.xlu1 %2375 }
 0x37d   : > { %2379 = vst.msk [vmem:[%s3224_s20 + $0x10] sm:$0xff] %vm2378_vm14, %v2376_v50 }
 0x37e   : > { %v2550_v60 = vpop.permute.xlu0 %2549 }
 0x37f   : > { %2552 = vst.msk [vmem:[%s3224_s20 + $0x18] sm:$0xff] %vm2397_vm15, %v2550_v60 }
 0x381   : > { %v2395_v1 = vpop.permute.xlu1 %2394 }
 0x382   : > { %2398 = vst.msk [vmem:[%s3224_s20 + $0x10] sm:$0xff] %vm2397_vm15, %v2395_v1 }
 0x383   : > { %v2568_v7 = vpop.permute.xlu0 %2567 }
 0x384   : > { %2570 = vst.msk [vmem:[%s3224_s20 + $0x18] sm:$0xff] %vm2416_vm0, %v2568_v7 }
 0x387   : > { %v2414_v55 = vpop.permute.xlu1 %2413 }
 0x388   : > { %2417 = vst.msk [vmem:[%s3224_s20 + $0x10] sm:$0xff] %vm2416_vm0, %v2414_v55 }
 0x38a   : > { %v2586_v57 = vpop.permute.xlu0 %2585 }
 0x38b   : > { %2588 = vst.msk [vmem:[%s3224_s20 + $0x18] sm:$0xff] %vm2435_vm1, %v2586_v57 }
 0x38e   : > { %v2433_v61 = vpop.permute.xlu1 %2432 }
 0x38f   : > { %2436 = vst.msk [vmem:[%s3224_s20 + $0x10] sm:$0xff] %vm2435_vm1, %v2433_v61 }
 0x391   : > { %v2604_v62 = vpop.permute.xlu0 %2603 }
 0x392   : > { %2606 = vst.msk [vmem:[%s3224_s20 + $0x18] sm:$0xff] %vm2454_vm2, %v2604_v62 }
 0x394   : > { %v2452_v0 = vpop.permute.xlu1 %2451 }
 0x395   : > { %2455 = vst.msk [vmem:[%s3224_s20 + $0x10] sm:$0xff] %vm2454_vm2, %v2452_v0 }
 0x398   : > { %v2622_v46 = vpop.permute.xlu0 %2621 }
 0x399   : > { %2624 = vst.msk [vmem:[%s3224_s20 + $0x18] sm:$0xff] %vm2473_vm3, %v2622_v46 }
 0x39b   : > { %v2471_v2 = vpop.permute.xlu1 %2470 }
 0x39c   : > { %2474 = vst.msk [vmem:[%s3224_s20 + $0x10] sm:$0xff] %vm2473_vm3, %v2471_v2 }
 0x39d PF: > { %s18_s29 = sadd.s32 1, %s2965_s29   ;;  %s3617_s27 = smov %s2961_s28 }
 0x39e   : > { %p15_p5 = scmp.ge.s32.totalorder %s18_s29, 4   ;;  %s3618_s28 = smov %s3620_s30 }
 0x3a0   :  { %17 = sbr.rel (!%p15_p5) target bundleno = 2 (0x2), region = 90 }

</bundles_post_ra>
